<compile_context>
chip_gen: v6e
topology: v6e:2x2x1
jax: 0.10.0
libtpu: 0.0.40
codegen_flags: <defaults>
</compile_context>

<pallas_src>
import jax
import jax.numpy as jnp
from jax.experimental import pallas as pl
from jax.experimental.pallas import tpu as pltpu

LRELU_SLOPE = 0.01
NORM_EPS = 1e-5


# ----------------------------- kernel ---------------------------------------

def _norm_lrelu(y, gamma, beta):
    """Per-graph instance norm over the node axis (axis=0), affine folded,
    followed by LeakyReLU.  One-pass stats: var = E[x^2] - E[x]^2."""
    mean = jnp.mean(y, axis=0, keepdims=True)              # (1, F)
    msq = jnp.mean(y * y, axis=0, keepdims=True)           # (1, F)
    var = jnp.maximum(msq - mean * mean, 0.0)
    scale = gamma * jax.lax.rsqrt(var + NORM_EPS)
    shift = beta - mean * scale
    y = y * scale + shift
    return jnp.where(y > 0, y, LRELU_SLOPE * y)


def make_decoder6_kernel(matmul_dtype=jnp.float32):
    cdt = matmul_dtype

    def mm(a, b):
        # MXU matmul; optionally bf16 inputs (v6e/v7x) with f32 accumulation.
        return jnp.dot(a.astype(cdt), b.astype(cdt),
                       preferred_element_type=jnp.float32)

    def kernel(x_ref, lhat_ref,
               w1, g1, e1, w2, g2, e2, w3, g3, e3, w4, g4, e4,
               wa, ga, ea, wb, gb, eb, o_ref):
        lhat = lhat_ref[...]                               # (nroi, nroi) of THIS graph

        # fc1..fc4 : Linear -> per-graph InstanceNorm -> LeakyReLU (dropout p=0).
        # Linear biases (and the repeated latent_vector path of fc1) are constant
        # over the nroi nodes and are cancelled by the norm's mean subtraction.
        h = _norm_lrelu(mm(x_ref[...], w1[...]), g1[...], e1[...])
        h = _norm_lrelu(mm(h, w2[...]), g2[...], e2[...])
        h = _norm_lrelu(mm(h, w3[...]), g3[...], e3[...])
        h = _norm_lrelu(mm(h, w4[...]), g4[...], e4[...])

        # graphconvblock1 : ChebConv(K=2, sym, lambda_max=2) -> norm -> lrelu.
        #   out = T0 @ W0 + T1 @ W1 with T0 = h, T1 = Lhat @ h; the K=2 pair is
        #   fused into one contraction over cat(h, Lhat h)  (K = 2*F = 128).
        th = mm(lhat, h)
        h = _norm_lrelu(mm(jnp.concatenate([h, th], axis=-1), wa[...]),
                        ga[...], ea[...])

        # graphconvblock2 (output columns zero-padded to 128 lanes -> dense store).
        th = mm(lhat, h)
        h = _norm_lrelu(mm(jnp.concatenate([h, th], axis=-1), wb[...]),
                        gb[...], eb[...])

        o_ref[...] = h.astype(o_ref.dtype)

    return kernel


# ----------------------------- wrapper --------------------------------------

def decoder6_forward(x, latent_vector, style_vector, edge_index, edge_attr,
                     batch_size, nroi, fc_params, gcn_params, batch_idx=None,
                     matmul_dtype=jnp.float32):
    # TODO(synk): style_vector / batch_idx modulation of the (unspecified)
    #             MLP_Graph_Unit / GCN_Unit internals is not implemented.
    del style_vector, batch_idx

    # latent_vector is repeated identically over the nroi nodes of each graph, so
    # its fc1 contribution is constant along the per-graph instance-norm axis and
    # is exactly cancelled by the mean subtraction (same argument used to drop the
    # Linear biases) -> dead compute, dropped.
    del latent_vector

    in_dim = x.shape[-1]
    x3d = x.reshape(batch_size, nroi, in_dim)

    # Batched per-graph scaled Chebyshev Laplacian (PyG ChebConv, sym norm,
    # lambda_max = 2):  Lhat = 2L/lambda_max - I = -D^{-1/2} A D^{-1/2}.
    # Shape (B, R, R) instead of the dense block-diagonal (B*R, B*R).
    # TODO(synk): the edge-list -> dense scatter has no clean Pallas equivalent
    #             at this size; built in plain JAX.
    src, dst = edge_index[0], edge_index[1]
    adj = jnp.zeros((batch_size, nroi, nroi), jnp.float32).at[
        src // nroi, src % nroi, dst % nroi].add(edge_attr)
    deg = adj.sum(axis=2)
    dinv = jnp.where(deg > 0, jax.lax.rsqrt(jnp.maximum(deg, 1e-12)), 0.0)
    lhat = -(dinv[:, :, None] * adj * dinv[:, None, :])          # (B, R, R)

    (w1f, g1, e1), (w2, g2, e2), (w3, g3, e3), (w4, g4, e4) = fc_params
    w1 = w1f[:in_dim]                            # latent rows of fc1's weight are dead
    (wa0, wa1, ga, ea), (wb0, wb1, gb, eb) = gcn_params

    # Fuse each ChebConv K=2 weight pair into one (2*din, dout) contraction.
    wa = jnp.concatenate([wa0, wa1], axis=0)
    wb = jnp.concatenate([wb0, wb1], axis=0)
    out_dim = wb.shape[1]

    # Lane-dense output: pad the last layer's columns up to a multiple of 128 so the
    # final store is an unmasked full-lane vst; sliced back just below.
    out_pad = ((out_dim + 127) // 128) * 128
    pad = out_pad - out_dim
    if pad:
        wb = jnp.pad(wb, ((0, 0), (0, pad)))
        gb = jnp.pad(gb, ((0, 0), (0, pad)))
        eb = jnp.pad(eb, ((0, 0), (0, pad)))

    weights = (w1, g1, e1, w2, g2, e2, w3, g3, e3, w4, g4, e4,
               wa, ga, ea, wb, gb, eb)

    def graph_spec(a):                           # one whole graph per grid step
        shp = a.shape
        return pl.BlockSpec((None,) + shp[1:], lambda b: (b, 0, 0))

    def resident_spec(a):                        # weights resident across the grid
        zeros = (0,) * a.ndim
        return pl.BlockSpec(a.shape, lambda b: zeros)

    out = pl.pallas_call(
        make_decoder6_kernel(matmul_dtype),
        out_shape=jax.ShapeDtypeStruct((batch_size, nroi, out_pad), jnp.float32),
        grid=(batch_size,),
        in_specs=[graph_spec(x3d), graph_spec(lhat)]
                 + [resident_spec(a) for a in weights],
        out_specs=pl.BlockSpec((None, nroi, out_pad), lambda b: (b, 0, 0)),
        compiler_params=pltpu.CompilerParams(
            dimension_semantics=("parallel",),        # v7x: 2 TCs split the batch
            vmem_limit_bytes=32 * 1024 * 1024),
    )(x3d, lhat, *weights)

    return out[..., :out_dim]


# ----------------------------- param / data setup ----------------------------

def make_fc_params(key, input_size, latent_size):
    f = input_size + latent_size
    dims = [(f, f), (f, f), (f, 2 * f), (2 * f, 2 * f)]
    params = []
    for din, dout in dims:
        key, kw, kg, kb = jax.random.split(key, 4)
        w = jax.random.normal(kw, (din, dout), jnp.float32) / jnp.sqrt(float(din))
        g = 1.0 + 0.1 * jax.random.normal(kg, (1, dout), jnp.float32)   # norm gamma
        e = 0.1 * jax.random.normal(kb, (1, dout), jnp.float32)         # norm beta
        params.append((w, g, e))
    return key, params


def make_gcn_params(key, dims):
    params = []
    for din, dout in dims:
        key, k0, k1, kg, kb = jax.random.split(key, 5)
        w0 = jax.random.normal(k0, (din, dout), jnp.float32) / jnp.sqrt(float(din))
        w1 = jax.random.normal(k1, (din, dout), jnp.float32) / jnp.sqrt(float(din))
        g = 1.0 + 0.1 * jax.random.normal(kg, (1, dout), jnp.float32)
        e = 0.1 * jax.random.normal(kb, (1, dout), jnp.float32)
        params.append((w0, w1, g, e))
    return key, params


def make_ring_edges(batch_size, nroi):
    """Bidirectional ring inside each sample (block-diagonal batched graph)."""
    src, dst = [], []
    for b in range(batch_size):
        off = b * nroi
        for i in range(nroi):
            j = (i + 1) % nroi
            src += [off + i, off + j]
            dst += [off + j, off + i]
    return jnp.array([src, dst], jnp.int32)


# ----------------------------- main -----------------------------------------

if __name__ == "__main__":
    batch_size, nroi = 2, 8
    input_size, latent_size, output_size, style_dim = 16, 16, 32, 8
    feature_size = input_size + latent_size                      # 32

    key = jax.random.PRNGKey(0)
    key, kx, kl, ks, ke = jax.random.split(key, 5)
    x = jax.random.normal(kx, (batch_size * nroi, input_size), jnp.float32)
    latent_vector = jax.random.normal(kl, (batch_size, latent_size), jnp.float32)
    style_vector = jax.random.normal(ks, (batch_size, style_dim), jnp.float32)

    edge_index = make_ring_edges(batch_size, nroi)               # (2, 32)
    edge_attr = jax.random.uniform(ke, (edge_index.shape[1],), jnp.float32,
                                   minval=0.5, maxval=1.5)

    key, fc_params = make_fc_params(key, input_size, latent_size)
    key, gcn_params = make_gcn_params(
        key, [(feature_size * 2, feature_size * 2),              # graphconvblock1
              (feature_size * 2, output_size)])                  # graphconvblock2

    out = decoder6_forward(x, latent_vector, style_vector, edge_index, edge_attr,
                           batch_size, nroi, fc_params, gcn_params)
    jax.block_until_ready(out)
    assert out.shape == (batch_size, nroi, output_size)
    assert out.dtype == jnp.float32
    print("KERNEL_OK")
</pallas_src>

<mosaic_0001>
module attributes {stable_mosaic.version = 11 : i64} {
  func.func @kernel(%arg0: i32, %arg1: memref<1x8x16xf32, #tpu.memory_space<vmem>>, %arg2: memref<1x8x8xf32, #tpu.memory_space<vmem>>, %arg3: memref<16x32xf32, #tpu.memory_space<vmem>>, %arg4: memref<1x32xf32, #tpu.memory_space<vmem>>, %arg5: memref<1x32xf32, #tpu.memory_space<vmem>>, %arg6: memref<32x32xf32, #tpu.memory_space<vmem>>, %arg7: memref<1x32xf32, #tpu.memory_space<vmem>>, %arg8: memref<1x32xf32, #tpu.memory_space<vmem>>, %arg9: memref<32x64xf32, #tpu.memory_space<vmem>>, %arg10: memref<1x64xf32, #tpu.memory_space<vmem>>, %arg11: memref<1x64xf32, #tpu.memory_space<vmem>>, %arg12: memref<64x64xf32, #tpu.memory_space<vmem>>, %arg13: memref<1x64xf32, #tpu.memory_space<vmem>>, %arg14: memref<1x64xf32, #tpu.memory_space<vmem>>, %arg15: memref<128x64xf32, #tpu.memory_space<vmem>>, %arg16: memref<1x64xf32, #tpu.memory_space<vmem>>, %arg17: memref<1x64xf32, #tpu.memory_space<vmem>>, %arg18: memref<128x128xf32, #tpu.memory_space<vmem>>, %arg19: memref<1x128xf32, #tpu.memory_space<vmem>>, %arg20: memref<1x128xf32, #tpu.memory_space<vmem>>, %arg21: memref<1x8x128xf32, #tpu.memory_space<vmem>>) attributes {dimension_semantics = [#tpu.dimension_semantics<parallel>], iteration_bounds = array<i64: 2>, scalar_prefetch = 0 : i64, scratch_operands = 0 : i64, tpu.core_type = #tpu.core_type<tc>, window_params = [{transform_indices = @transform_0, window_bounds = array<i64: 1, 8, 16>}, {transform_indices = @transform_1, window_bounds = array<i64: 1, 8, 8>}, {pipeline_mode = #tpu.pipeline_mode<synchronous>, transform_indices = @transform_2, window_bounds = array<i64: 16, 32>}, {pipeline_mode = #tpu.pipeline_mode<synchronous>, transform_indices = @transform_3, window_bounds = array<i64: 1, 32>}, {pipeline_mode = #tpu.pipeline_mode<synchronous>, transform_indices = @transform_4, window_bounds = array<i64: 1, 32>}, {pipeline_mode = #tpu.pipeline_mode<synchronous>, transform_indices = @transform_5, window_bounds = array<i64: 32, 32>}, {pipeline_mode = #tpu.pipeline_mode<synchronous>, transform_indices = @transform_6, window_bounds = array<i64: 1, 32>}, {pipeline_mode = #tpu.pipeline_mode<synchronous>, transform_indices = @transform_7, window_bounds = array<i64: 1, 32>}, {pipeline_mode = #tpu.pipeline_mode<synchronous>, transform_indices = @transform_8, window_bounds = array<i64: 32, 64>}, {pipeline_mode = #tpu.pipeline_mode<synchronous>, transform_indices = @transform_9, window_bounds = array<i64: 1, 64>}, {pipeline_mode = #tpu.pipeline_mode<synchronous>, transform_indices = @transform_10, window_bounds = array<i64: 1, 64>}, {pipeline_mode = #tpu.pipeline_mode<synchronous>, transform_indices = @transform_11, window_bounds = array<i64: 64, 64>}, {pipeline_mode = #tpu.pipeline_mode<synchronous>, transform_indices = @transform_12, window_bounds = array<i64: 1, 64>}, {pipeline_mode = #tpu.pipeline_mode<synchronous>, transform_indices = @transform_13, window_bounds = array<i64: 1, 64>}, {pipeline_mode = #tpu.pipeline_mode<synchronous>, transform_indices = @transform_14, window_bounds = array<i64: 128, 64>}, {pipeline_mode = #tpu.pipeline_mode<synchronous>, transform_indices = @transform_15, window_bounds = array<i64: 1, 64>}, {pipeline_mode = #tpu.pipeline_mode<synchronous>, transform_indices = @transform_16, window_bounds = array<i64: 1, 64>}, {pipeline_mode = #tpu.pipeline_mode<synchronous>, transform_indices = @transform_17, window_bounds = array<i64: 128, 128>}, {pipeline_mode = #tpu.pipeline_mode<synchronous>, transform_indices = @transform_18, window_bounds = array<i64: 1, 128>}, {pipeline_mode = #tpu.pipeline_mode<synchronous>, transform_indices = @transform_19, window_bounds = array<i64: 1, 128>}, {transform_indices = @transform_20, window_bounds = array<i64: 1, 8, 128>}]} {
    %c0 = arith.constant 0 : index
    %c0_0 = arith.constant 0 : index
    %c0_1 = arith.constant 0 : index
    %0 = vector.load %arg2[%c0, %c0_0, %c0_1] : memref<1x8x8xf32, #tpu.memory_space<vmem>>, vector<1x8x8xf32>
    %1 = vector.shape_cast %0 : vector<1x8x8xf32> to vector<8x8xf32>
    %c0_2 = arith.constant 0 : index
    %c0_3 = arith.constant 0 : index
    %c0_4 = arith.constant 0 : index
    %2 = vector.load %arg1[%c0_2, %c0_3, %c0_4] : memref<1x8x16xf32, #tpu.memory_space<vmem>>, vector<1x8x16xf32>
    %3 = vector.shape_cast %2 : vector<1x8x16xf32> to vector<8x16xf32>
    %c0_5 = arith.constant 0 : index
    %c0_6 = arith.constant 0 : index
    %4 = vector.load %arg3[%c0_5, %c0_6] : memref<16x32xf32, #tpu.memory_space<vmem>>, vector<16x32xf32>
    %cst = arith.constant dense<0.000000e+00> : vector<8x32xf32>
    %5 = tpu.matmul %3, %4, %cst {dimension_numbers = #tpu.dot_dimension_numbers<[1], [0], [0], [1], [0, 0, 1, 1], [], []>} : vector<8x16xf32>, vector<16x32xf32>, vector<8x32xf32> -> vector<8x32xf32>
    %c0_7 = arith.constant 0 : index
    %c0_8 = arith.constant 0 : index
    %6 = vector.load %arg4[%c0_7, %c0_8] : memref<1x32xf32, #tpu.memory_space<vmem>>, vector<1x32xf32>
    %c0_9 = arith.constant 0 : index
    %c0_10 = arith.constant 0 : index
    %7 = vector.load %arg5[%c0_9, %c0_10] : memref<1x32xf32, #tpu.memory_space<vmem>>, vector<1x32xf32>
    %cst_11 = arith.constant dense<0.000000e+00> : vector<32xf32>
    %8 = vector.multi_reduction <add>, %5, %cst_11 [0] : vector<8x32xf32> to vector<32xf32>
    %9 = vector.shape_cast %8 : vector<32xf32> to vector<1x32xf32>
    %cst_12 = arith.constant 8.000000e+00 : f32
    %10 = vector.broadcast %cst_12 : f32 to vector<1x32xf32>
    %11 = arith.divf %9, %10 : vector<1x32xf32>
    %12 = arith.mulf %5, %5 : vector<8x32xf32>
    %cst_13 = arith.constant dense<0.000000e+00> : vector<32xf32>
    %13 = vector.multi_reduction <add>, %12, %cst_13 [0] : vector<8x32xf32> to vector<32xf32>
    %14 = vector.shape_cast %13 : vector<32xf32> to vector<1x32xf32>
    %cst_14 = arith.constant 8.000000e+00 : f32
    %15 = vector.broadcast %cst_14 : f32 to vector<1x32xf32>
    %16 = arith.divf %14, %15 : vector<1x32xf32>
    %17 = arith.mulf %11, %11 : vector<1x32xf32>
    %18 = arith.subf %16, %17 : vector<1x32xf32>
    %cst_15 = arith.constant 0.000000e+00 : f32
    %19 = vector.broadcast %cst_15 : f32 to vector<1x32xf32>
    %20 = arith.maximumf %18, %19 : vector<1x32xf32>
    %cst_16 = arith.constant 9.99999974E-6 : f32
    %21 = vector.broadcast %cst_16 : f32 to vector<1x32xf32>
    %22 = arith.addf %20, %21 : vector<1x32xf32>
    %23 = math.rsqrt %22 : vector<1x32xf32>
    %24 = arith.mulf %6, %23 : vector<1x32xf32>
    %25 = arith.mulf %11, %24 : vector<1x32xf32>
    %26 = arith.subf %7, %25 : vector<1x32xf32>
    %27 = vector.broadcast %24 : vector<1x32xf32> to vector<8x32xf32>
    %28 = arith.mulf %5, %27 : vector<8x32xf32>
    %29 = vector.broadcast %26 : vector<1x32xf32> to vector<8x32xf32>
    %30 = arith.addf %28, %29 : vector<8x32xf32>
    %cst_17 = arith.constant 0.000000e+00 : f32
    %31 = vector.broadcast %cst_17 : f32 to vector<8x32xf32>
    %32 = arith.cmpf ogt, %30, %31 : vector<8x32xf32>
    %cst_18 = arith.constant 0.00999999977 : f32
    %33 = vector.broadcast %cst_18 : f32 to vector<8x32xf32>
    %34 = arith.mulf %33, %30 : vector<8x32xf32>
    %35 = arith.select %32, %30, %34 : vector<8x32xi1>, vector<8x32xf32>
    %c0_19 = arith.constant 0 : index
    %c0_20 = arith.constant 0 : index
    %36 = vector.load %arg6[%c0_19, %c0_20] : memref<32x32xf32, #tpu.memory_space<vmem>>, vector<32x32xf32>
    %cst_21 = arith.constant dense<0.000000e+00> : vector<8x32xf32>
    %37 = tpu.matmul %35, %36, %cst_21 {dimension_numbers = #tpu.dot_dimension_numbers<[1], [0], [0], [1], [0, 0, 1, 1], [], []>} : vector<8x32xf32>, vector<32x32xf32>, vector<8x32xf32> -> vector<8x32xf32>
    %c0_22 = arith.constant 0 : index
    %c0_23 = arith.constant 0 : index
    %38 = vector.load %arg7[%c0_22, %c0_23] : memref<1x32xf32, #tpu.memory_space<vmem>>, vector<1x32xf32>
    %c0_24 = arith.constant 0 : index
    %c0_25 = arith.constant 0 : index
    %39 = vector.load %arg8[%c0_24, %c0_25] : memref<1x32xf32, #tpu.memory_space<vmem>>, vector<1x32xf32>
    %cst_26 = arith.constant dense<0.000000e+00> : vector<32xf32>
    %40 = vector.multi_reduction <add>, %37, %cst_26 [0] : vector<8x32xf32> to vector<32xf32>
    %41 = vector.shape_cast %40 : vector<32xf32> to vector<1x32xf32>
    %cst_27 = arith.constant 8.000000e+00 : f32
    %42 = vector.broadcast %cst_27 : f32 to vector<1x32xf32>
    %43 = arith.divf %41, %42 : vector<1x32xf32>
    %44 = arith.mulf %37, %37 : vector<8x32xf32>
    %cst_28 = arith.constant dense<0.000000e+00> : vector<32xf32>
    %45 = vector.multi_reduction <add>, %44, %cst_28 [0] : vector<8x32xf32> to vector<32xf32>
    %46 = vector.shape_cast %45 : vector<32xf32> to vector<1x32xf32>
    %cst_29 = arith.constant 8.000000e+00 : f32
    %47 = vector.broadcast %cst_29 : f32 to vector<1x32xf32>
    %48 = arith.divf %46, %47 : vector<1x32xf32>
    %49 = arith.mulf %43, %43 : vector<1x32xf32>
    %50 = arith.subf %48, %49 : vector<1x32xf32>
    %cst_30 = arith.constant 0.000000e+00 : f32
    %51 = vector.broadcast %cst_30 : f32 to vector<1x32xf32>
    %52 = arith.maximumf %50, %51 : vector<1x32xf32>
    %cst_31 = arith.constant 9.99999974E-6 : f32
    %53 = vector.broadcast %cst_31 : f32 to vector<1x32xf32>
    %54 = arith.addf %52, %53 : vector<1x32xf32>
    %55 = math.rsqrt %54 : vector<1x32xf32>
    %56 = arith.mulf %38, %55 : vector<1x32xf32>
    %57 = arith.mulf %43, %56 : vector<1x32xf32>
    %58 = arith.subf %39, %57 : vector<1x32xf32>
    %59 = vector.broadcast %56 : vector<1x32xf32> to vector<8x32xf32>
    %60 = arith.mulf %37, %59 : vector<8x32xf32>
    %61 = vector.broadcast %58 : vector<1x32xf32> to vector<8x32xf32>
    %62 = arith.addf %60, %61 : vector<8x32xf32>
    %cst_32 = arith.constant 0.000000e+00 : f32
    %63 = vector.broadcast %cst_32 : f32 to vector<8x32xf32>
    %64 = arith.cmpf ogt, %62, %63 : vector<8x32xf32>
    %cst_33 = arith.constant 0.00999999977 : f32
    %65 = vector.broadcast %cst_33 : f32 to vector<8x32xf32>
    %66 = arith.mulf %65, %62 : vector<8x32xf32>
    %67 = arith.select %64, %62, %66 : vector<8x32xi1>, vector<8x32xf32>
    %c0_34 = arith.constant 0 : index
    %c0_35 = arith.constant 0 : index
    %68 = vector.load %arg9[%c0_34, %c0_35] : memref<32x64xf32, #tpu.memory_space<vmem>>, vector<32x64xf32>
    %cst_36 = arith.constant dense<0.000000e+00> : vector<8x64xf32>
    %69 = tpu.matmul %67, %68, %cst_36 {dimension_numbers = #tpu.dot_dimension_numbers<[1], [0], [0], [1], [0, 0, 1, 1], [], []>} : vector<8x32xf32>, vector<32x64xf32>, vector<8x64xf32> -> vector<8x64xf32>
    %c0_37 = arith.constant 0 : index
    %c0_38 = arith.constant 0 : index
    %70 = vector.load %arg10[%c0_37, %c0_38] : memref<1x64xf32, #tpu.memory_space<vmem>>, vector<1x64xf32>
    %c0_39 = arith.constant 0 : index
    %c0_40 = arith.constant 0 : index
    %71 = vector.load %arg11[%c0_39, %c0_40] : memref<1x64xf32, #tpu.memory_space<vmem>>, vector<1x64xf32>
    %cst_41 = arith.constant dense<0.000000e+00> : vector<64xf32>
    %72 = vector.multi_reduction <add>, %69, %cst_41 [0] : vector<8x64xf32> to vector<64xf32>
    %73 = vector.shape_cast %72 : vector<64xf32> to vector<1x64xf32>
    %cst_42 = arith.constant 8.000000e+00 : f32
    %74 = vector.broadcast %cst_42 : f32 to vector<1x64xf32>
    %75 = arith.divf %73, %74 : vector<1x64xf32>
    %76 = arith.mulf %69, %69 : vector<8x64xf32>
    %cst_43 = arith.constant dense<0.000000e+00> : vector<64xf32>
    %77 = vector.multi_reduction <add>, %76, %cst_43 [0] : vector<8x64xf32> to vector<64xf32>
    %78 = vector.shape_cast %77 : vector<64xf32> to vector<1x64xf32>
    %cst_44 = arith.constant 8.000000e+00 : f32
    %79 = vector.broadcast %cst_44 : f32 to vector<1x64xf32>
    %80 = arith.divf %78, %79 : vector<1x64xf32>
    %81 = arith.mulf %75, %75 : vector<1x64xf32>
    %82 = arith.subf %80, %81 : vector<1x64xf32>
    %cst_45 = arith.constant 0.000000e+00 : f32
    %83 = vector.broadcast %cst_45 : f32 to vector<1x64xf32>
    %84 = arith.maximumf %82, %83 : vector<1x64xf32>
    %cst_46 = arith.constant 9.99999974E-6 : f32
    %85 = vector.broadcast %cst_46 : f32 to vector<1x64xf32>
    %86 = arith.addf %84, %85 : vector<1x64xf32>
    %87 = math.rsqrt %86 : vector<1x64xf32>
    %88 = arith.mulf %70, %87 : vector<1x64xf32>
    %89 = arith.mulf %75, %88 : vector<1x64xf32>
    %90 = arith.subf %71, %89 : vector<1x64xf32>
    %91 = vector.broadcast %88 : vector<1x64xf32> to vector<8x64xf32>
    %92 = arith.mulf %69, %91 : vector<8x64xf32>
    %93 = vector.broadcast %90 : vector<1x64xf32> to vector<8x64xf32>
    %94 = arith.addf %92, %93 : vector<8x64xf32>
    %cst_47 = arith.constant 0.000000e+00 : f32
    %95 = vector.broadcast %cst_47 : f32 to vector<8x64xf32>
    %96 = arith.cmpf ogt, %94, %95 : vector<8x64xf32>
    %cst_48 = arith.constant 0.00999999977 : f32
    %97 = vector.broadcast %cst_48 : f32 to vector<8x64xf32>
    %98 = arith.mulf %97, %94 : vector<8x64xf32>
    %99 = arith.select %96, %94, %98 : vector<8x64xi1>, vector<8x64xf32>
    %c0_49 = arith.constant 0 : index
    %c0_50 = arith.constant 0 : index
    %100 = vector.load %arg12[%c0_49, %c0_50] : memref<64x64xf32, #tpu.memory_space<vmem>>, vector<64x64xf32>
    %cst_51 = arith.constant dense<0.000000e+00> : vector<8x64xf32>
    %101 = tpu.matmul %99, %100, %cst_51 {dimension_numbers = #tpu.dot_dimension_numbers<[1], [0], [0], [1], [0, 0, 1, 1], [], []>} : vector<8x64xf32>, vector<64x64xf32>, vector<8x64xf32> -> vector<8x64xf32>
    %c0_52 = arith.constant 0 : index
    %c0_53 = arith.constant 0 : index
    %102 = vector.load %arg13[%c0_52, %c0_53] : memref<1x64xf32, #tpu.memory_space<vmem>>, vector<1x64xf32>
    %c0_54 = arith.constant 0 : index
    %c0_55 = arith.constant 0 : index
    %103 = vector.load %arg14[%c0_54, %c0_55] : memref<1x64xf32, #tpu.memory_space<vmem>>, vector<1x64xf32>
    %cst_56 = arith.constant dense<0.000000e+00> : vector<64xf32>
    %104 = vector.multi_reduction <add>, %101, %cst_56 [0] : vector<8x64xf32> to vector<64xf32>
    %105 = vector.shape_cast %104 : vector<64xf32> to vector<1x64xf32>
    %cst_57 = arith.constant 8.000000e+00 : f32
    %106 = vector.broadcast %cst_57 : f32 to vector<1x64xf32>
    %107 = arith.divf %105, %106 : vector<1x64xf32>
    %108 = arith.mulf %101, %101 : vector<8x64xf32>
    %cst_58 = arith.constant dense<0.000000e+00> : vector<64xf32>
    %109 = vector.multi_reduction <add>, %108, %cst_58 [0] : vector<8x64xf32> to vector<64xf32>
    %110 = vector.shape_cast %109 : vector<64xf32> to vector<1x64xf32>
    %cst_59 = arith.constant 8.000000e+00 : f32
    %111 = vector.broadcast %cst_59 : f32 to vector<1x64xf32>
    %112 = arith.divf %110, %111 : vector<1x64xf32>
    %113 = arith.mulf %107, %107 : vector<1x64xf32>
    %114 = arith.subf %112, %113 : vector<1x64xf32>
    %cst_60 = arith.constant 0.000000e+00 : f32
    %115 = vector.broadcast %cst_60 : f32 to vector<1x64xf32>
    %116 = arith.maximumf %114, %115 : vector<1x64xf32>
    %cst_61 = arith.constant 9.99999974E-6 : f32
    %117 = vector.broadcast %cst_61 : f32 to vector<1x64xf32>
    %118 = arith.addf %116, %117 : vector<1x64xf32>
    %119 = math.rsqrt %118 : vector<1x64xf32>
    %120 = arith.mulf %102, %119 : vector<1x64xf32>
    %121 = arith.mulf %107, %120 : vector<1x64xf32>
    %122 = arith.subf %103, %121 : vector<1x64xf32>
    %123 = vector.broadcast %120 : vector<1x64xf32> to vector<8x64xf32>
    %124 = arith.mulf %101, %123 : vector<8x64xf32>
    %125 = vector.broadcast %122 : vector<1x64xf32> to vector<8x64xf32>
    %126 = arith.addf %124, %125 : vector<8x64xf32>
    %cst_62 = arith.constant 0.000000e+00 : f32
    %127 = vector.broadcast %cst_62 : f32 to vector<8x64xf32>
    %128 = arith.cmpf ogt, %126, %127 : vector<8x64xf32>
    %cst_63 = arith.constant 0.00999999977 : f32
    %129 = vector.broadcast %cst_63 : f32 to vector<8x64xf32>
    %130 = arith.mulf %129, %126 : vector<8x64xf32>
    %131 = arith.select %128, %126, %130 : vector<8x64xi1>, vector<8x64xf32>
    %cst_64 = arith.constant dense<0.000000e+00> : vector<8x64xf32>
    %132 = tpu.matmul %1, %131, %cst_64 {dimension_numbers = #tpu.dot_dimension_numbers<[1], [0], [0], [1], [0, 0, 1, 1], [], []>} : vector<8x8xf32>, vector<8x64xf32>, vector<8x64xf32> -> vector<8x64xf32>
    %133 = tpu.concatenate %131, %132 in 1 : vector<8x64xf32>, vector<8x64xf32> -> vector<8x128xf32>
    %c0_65 = arith.constant 0 : index
    %c0_66 = arith.constant 0 : index
    %134 = vector.load %arg15[%c0_65, %c0_66] : memref<128x64xf32, #tpu.memory_space<vmem>>, vector<128x64xf32>
    %cst_67 = arith.constant dense<0.000000e+00> : vector<8x64xf32>
    %135 = tpu.matmul %133, %134, %cst_67 {dimension_numbers = #tpu.dot_dimension_numbers<[1], [0], [0], [1], [0, 0, 1, 1], [], []>} : vector<8x128xf32>, vector<128x64xf32>, vector<8x64xf32> -> vector<8x64xf32>
    %c0_68 = arith.constant 0 : index
    %c0_69 = arith.constant 0 : index
    %136 = vector.load %arg16[%c0_68, %c0_69] : memref<1x64xf32, #tpu.memory_space<vmem>>, vector<1x64xf32>
    %c0_70 = arith.constant 0 : index
    %c0_71 = arith.constant 0 : index
    %137 = vector.load %arg17[%c0_70, %c0_71] : memref<1x64xf32, #tpu.memory_space<vmem>>, vector<1x64xf32>
    %cst_72 = arith.constant dense<0.000000e+00> : vector<64xf32>
    %138 = vector.multi_reduction <add>, %135, %cst_72 [0] : vector<8x64xf32> to vector<64xf32>
    %139 = vector.shape_cast %138 : vector<64xf32> to vector<1x64xf32>
    %cst_73 = arith.constant 8.000000e+00 : f32
    %140 = vector.broadcast %cst_73 : f32 to vector<1x64xf32>
    %141 = arith.divf %139, %140 : vector<1x64xf32>
    %142 = arith.mulf %135, %135 : vector<8x64xf32>
    %cst_74 = arith.constant dense<0.000000e+00> : vector<64xf32>
    %143 = vector.multi_reduction <add>, %142, %cst_74 [0] : vector<8x64xf32> to vector<64xf32>
    %144 = vector.shape_cast %143 : vector<64xf32> to vector<1x64xf32>
    %cst_75 = arith.constant 8.000000e+00 : f32
    %145 = vector.broadcast %cst_75 : f32 to vector<1x64xf32>
    %146 = arith.divf %144, %145 : vector<1x64xf32>
    %147 = arith.mulf %141, %141 : vector<1x64xf32>
    %148 = arith.subf %146, %147 : vector<1x64xf32>
    %cst_76 = arith.constant 0.000000e+00 : f32
    %149 = vector.broadcast %cst_76 : f32 to vector<1x64xf32>
    %150 = arith.maximumf %148, %149 : vector<1x64xf32>
    %cst_77 = arith.constant 9.99999974E-6 : f32
    %151 = vector.broadcast %cst_77 : f32 to vector<1x64xf32>
    %152 = arith.addf %150, %151 : vector<1x64xf32>
    %153 = math.rsqrt %152 : vector<1x64xf32>
    %154 = arith.mulf %136, %153 : vector<1x64xf32>
    %155 = arith.mulf %141, %154 : vector<1x64xf32>
    %156 = arith.subf %137, %155 : vector<1x64xf32>
    %157 = vector.broadcast %154 : vector<1x64xf32> to vector<8x64xf32>
    %158 = arith.mulf %135, %157 : vector<8x64xf32>
    %159 = vector.broadcast %156 : vector<1x64xf32> to vector<8x64xf32>
    %160 = arith.addf %158, %159 : vector<8x64xf32>
    %cst_78 = arith.constant 0.000000e+00 : f32
    %161 = vector.broadcast %cst_78 : f32 to vector<8x64xf32>
    %162 = arith.cmpf ogt, %160, %161 : vector<8x64xf32>
    %cst_79 = arith.constant 0.00999999977 : f32
    %163 = vector.broadcast %cst_79 : f32 to vector<8x64xf32>
    %164 = arith.mulf %163, %160 : vector<8x64xf32>
    %165 = arith.select %162, %160, %164 : vector<8x64xi1>, vector<8x64xf32>
    %cst_80 = arith.constant dense<0.000000e+00> : vector<8x64xf32>
    %166 = tpu.matmul %1, %165, %cst_80 {dimension_numbers = #tpu.dot_dimension_numbers<[1], [0], [0], [1], [0, 0, 1, 1], [], []>} : vector<8x8xf32>, vector<8x64xf32>, vector<8x64xf32> -> vector<8x64xf32>
    %167 = tpu.concatenate %165, %166 in 1 : vector<8x64xf32>, vector<8x64xf32> -> vector<8x128xf32>
    %c0_81 = arith.constant 0 : index
    %c0_82 = arith.constant 0 : index
    %168 = vector.load %arg18[%c0_81, %c0_82] : memref<128x128xf32, #tpu.memory_space<vmem>>, vector<128x128xf32>
    %cst_83 = arith.constant dense<0.000000e+00> : vector<8x128xf32>
    %169 = tpu.matmul %167, %168, %cst_83 {dimension_numbers = #tpu.dot_dimension_numbers<[1], [0], [0], [1], [0, 0, 1, 1], [], []>} : vector<8x128xf32>, vector<128x128xf32>, vector<8x128xf32> -> vector<8x128xf32>
    %c0_84 = arith.constant 0 : index
    %c0_85 = arith.constant 0 : index
    %170 = vector.load %arg19[%c0_84, %c0_85] : memref<1x128xf32, #tpu.memory_space<vmem>>, vector<1x128xf32>
    %c0_86 = arith.constant 0 : index
    %c0_87 = arith.constant 0 : index
    %171 = vector.load %arg20[%c0_86, %c0_87] : memref<1x128xf32, #tpu.memory_space<vmem>>, vector<1x128xf32>
    %cst_88 = arith.constant dense<0.000000e+00> : vector<128xf32>
    %172 = vector.multi_reduction <add>, %169, %cst_88 [0] : vector<8x128xf32> to vector<128xf32>
    %173 = vector.shape_cast %172 : vector<128xf32> to vector<1x128xf32>
    %cst_89 = arith.constant 8.000000e+00 : f32
    %174 = vector.broadcast %cst_89 : f32 to vector<1x128xf32>
    %175 = arith.divf %173, %174 : vector<1x128xf32>
    %176 = arith.mulf %169, %169 : vector<8x128xf32>
    %cst_90 = arith.constant dense<0.000000e+00> : vector<128xf32>
    %177 = vector.multi_reduction <add>, %176, %cst_90 [0] : vector<8x128xf32> to vector<128xf32>
    %178 = vector.shape_cast %177 : vector<128xf32> to vector<1x128xf32>
    %cst_91 = arith.constant 8.000000e+00 : f32
    %179 = vector.broadcast %cst_91 : f32 to vector<1x128xf32>
    %180 = arith.divf %178, %179 : vector<1x128xf32>
    %181 = arith.mulf %175, %175 : vector<1x128xf32>
    %182 = arith.subf %180, %181 : vector<1x128xf32>
    %cst_92 = arith.constant 0.000000e+00 : f32
    %183 = vector.broadcast %cst_92 : f32 to vector<1x128xf32>
    %184 = arith.maximumf %182, %183 : vector<1x128xf32>
    %cst_93 = arith.constant 9.99999974E-6 : f32
    %185 = vector.broadcast %cst_93 : f32 to vector<1x128xf32>
    %186 = arith.addf %184, %185 : vector<1x128xf32>
    %187 = math.rsqrt %186 : vector<1x128xf32>
    %188 = arith.mulf %170, %187 : vector<1x128xf32>
    %189 = arith.mulf %175, %188 : vector<1x128xf32>
    %190 = arith.subf %171, %189 : vector<1x128xf32>
    %191 = vector.broadcast %188 : vector<1x128xf32> to vector<8x128xf32>
    %192 = arith.mulf %169, %191 : vector<8x128xf32>
    %193 = vector.broadcast %190 : vector<1x128xf32> to vector<8x128xf32>
    %194 = arith.addf %192, %193 : vector<8x128xf32>
    %cst_94 = arith.constant 0.000000e+00 : f32
    %195 = vector.broadcast %cst_94 : f32 to vector<8x128xf32>
    %196 = arith.cmpf ogt, %194, %195 : vector<8x128xf32>
    %cst_95 = arith.constant 0.00999999977 : f32
    %197 = vector.broadcast %cst_95 : f32 to vector<8x128xf32>
    %198 = arith.mulf %197, %194 : vector<8x128xf32>
    %199 = arith.select %196, %194, %198 : vector<8x128xi1>, vector<8x128xf32>
    %c0_96 = arith.constant 0 : index
    %c0_97 = arith.constant 0 : index
    %c0_98 = arith.constant 0 : index
    %200 = vector.load %arg21[%c0_96, %c0_97, %c0_98] : memref<1x8x128xf32, #tpu.memory_space<vmem>>, vector<1x8x128xf32>
    %201 = vector.shape_cast %200 : vector<1x8x128xf32> to vector<8x128xf32>
    %202 = vector.shape_cast %199 : vector<8x128xf32> to vector<1x8x128xf32>
    tpu.vector_store %arg21[%c0_96, %c0_97, %c0_98], %202 {strides = array<i32>} : memref<1x8x128xf32, #tpu.memory_space<vmem>>, vector<1x8x128xf32>,
    return
  }
  func.func @transform_0(%arg0: i32) -> (i32, i32, i32) {
    %c0_i32 = arith.constant 0 : i32
    %c0_i32_0 = arith.constant 0 : i32
    %c0_i32_1 = arith.constant 0 : i32
    return %arg0, %c0_i32, %c0_i32_0 : i32, i32, i32
  }
  func.func @transform_1(%arg0: i32) -> (i32, i32, i32) {
    %c0_i32 = arith.constant 0 : i32
    %c0_i32_0 = arith.constant 0 : i32
    %c0_i32_1 = arith.constant 0 : i32
    return %arg0, %c0_i32, %c0_i32_0 : i32, i32, i32
  }
  func.func @transform_2(%arg0: i32) -> (i32, i32) {
    %c0_i32 = arith.constant 0 : i32
    %c0_i32_0 = arith.constant 0 : i32
    %c0_i32_1 = arith.constant 0 : i32
    return %c0_i32, %c0_i32_0 : i32, i32
  }
  func.func @transform_3(%arg0: i32) -> (i32, i32) {
    %c0_i32 = arith.constant 0 : i32
    %c0_i32_0 = arith.constant 0 : i32
    %c0_i32_1 = arith.constant 0 : i32
    return %c0_i32, %c0_i32_0 : i32, i32
  }
  func.func @transform_4(%arg0: i32) -> (i32, i32) {
    %c0_i32 = arith.constant 0 : i32
    %c0_i32_0 = arith.constant 0 : i32
    %c0_i32_1 = arith.constant 0 : i32
    return %c0_i32, %c0_i32_0 : i32, i32
  }
  func.func @transform_5(%arg0: i32) -> (i32, i32) {
    %c0_i32 = arith.constant 0 : i32
    %c0_i32_0 = arith.constant 0 : i32
    %c0_i32_1 = arith.constant 0 : i32
    return %c0_i32, %c0_i32_0 : i32, i32
  }
  func.func @transform_6(%arg0: i32) -> (i32, i32) {
    %c0_i32 = arith.constant 0 : i32
    %c0_i32_0 = arith.constant 0 : i32
    %c0_i32_1 = arith.constant 0 : i32
    return %c0_i32, %c0_i32_0 : i32, i32
  }
  func.func @transform_7(%arg0: i32) -> (i32, i32) {
    %c0_i32 = arith.constant 0 : i32
    %c0_i32_0 = arith.constant 0 : i32
    %c0_i32_1 = arith.constant 0 : i32
    return %c0_i32, %c0_i32_0 : i32, i32
  }
  func.func @transform_8(%arg0: i32) -> (i32, i32) {
    %c0_i32 = arith.constant 0 : i32
    %c0_i32_0 = arith.constant 0 : i32
    %c0_i32_1 = arith.constant 0 : i32
    return %c0_i32, %c0_i32_0 : i32, i32
  }
  func.func @transform_9(%arg0: i32) -> (i32, i32) {
    %c0_i32 = arith.constant 0 : i32
    %c0_i32_0 = arith.constant 0 : i32
    %c0_i32_1 = arith.constant 0 : i32
    return %c0_i32, %c0_i32_0 : i32, i32
  }
  func.func @transform_10(%arg0: i32) -> (i32, i32) {
    %c0_i32 = arith.constant 0 : i32
    %c0_i32_0 = arith.constant 0 : i32
    %c0_i32_1 = arith.constant 0 : i32
    return %c0_i32, %c0_i32_0 : i32, i32
  }
  func.func @transform_11(%arg0: i32) -> (i32, i32) {
    %c0_i32 = arith.constant 0 : i32
    %c0_i32_0 = arith.constant 0 : i32
    %c0_i32_1 = arith.constant 0 : i32
    return %c0_i32, %c0_i32_0 : i32, i32
  }
  func.func @transform_12(%arg0: i32) -> (i32, i32) {
    %c0_i32 = arith.constant 0 : i32
    %c0_i32_0 = arith.constant 0 : i32
    %c0_i32_1 = arith.constant 0 : i32
    return %c0_i32, %c0_i32_0 : i32, i32
  }
  func.func @transform_13(%arg0: i32) -> (i32, i32) {
    %c0_i32 = arith.constant 0 : i32
    %c0_i32_0 = arith.constant 0 : i32
    %c0_i32_1 = arith.constant 0 : i32
    return %c0_i32, %c0_i32_0 : i32, i32
  }
  func.func @transform_14(%arg0: i32) -> (i32, i32) {
    %c0_i32 = arith.constant 0 : i32
    %c0_i32_0 = arith.constant 0 : i32
    %c0_i32_1 = arith.constant 0 : i32
    return %c0_i32, %c0_i32_0 : i32, i32
  }
  func.func @transform_15(%arg0: i32) -> (i32, i32) {
    %c0_i32 = arith.constant 0 : i32
    %c0_i32_0 = arith.constant 0 : i32
    %c0_i32_1 = arith.constant 0 : i32
    return %c0_i32, %c0_i32_0 : i32, i32
  }
  func.func @transform_16(%arg0: i32) -> (i32, i32) {
    %c0_i32 = arith.constant 0 : i32
    %c0_i32_0 = arith.constant 0 : i32
    %c0_i32_1 = arith.constant 0 : i32
    return %c0_i32, %c0_i32_0 : i32, i32
  }
  func.func @transform_17(%arg0: i32) -> (i32, i32) {
    %c0_i32 = arith.constant 0 : i32
    %c0_i32_0 = arith.constant 0 : i32
    %c0_i32_1 = arith.constant 0 : i32
    return %c0_i32, %c0_i32_0 : i32, i32
  }
  func.func @transform_18(%arg0: i32) -> (i32, i32) {
    %c0_i32 = arith.constant 0 : i32
    %c0_i32_0 = arith.constant 0 : i32
    %c0_i32_1 = arith.constant 0 : i32
    return %c0_i32, %c0_i32_0 : i32, i32
  }
  func.func @transform_19(%arg0: i32) -> (i32, i32) {
    %c0_i32 = arith.constant 0 : i32
    %c0_i32_0 = arith.constant 0 : i32
    %c0_i32_1 = arith.constant 0 : i32
    return %c0_i32, %c0_i32_0 : i32, i32
  }
  func.func @transform_20(%arg0: i32) -> (i32, i32, i32) {
    %c0_i32 = arith.constant 0 : i32
    %c0_i32_0 = arith.constant 0 : i32
    %c0_i32_1 = arith.constant 0 : i32
    return %arg0, %c0_i32, %c0_i32_0 : i32, i32, i32
  }
}

</mosaic_0001>

<bundles_post_ra>
// kernel: tpu_custom_call.1
= control target key start
LH: loop header
LB: loop body
LE: loop exit
PB: predicated region body
PF: predicated region fallthrough
CT: control target
= control target key end

     0   :  { %s2794_s0 = inlined_call_operand.vmem [shape: f32[2,8,16], index: 0, kind: input, shape index: {}]   ;;  %s2795_s1 = inlined_call_operand.hbm [shape: f32[2,8,8], index: 1, kind: input, shape index: {}]   ;;  %s2796_s2 = inlined_call_operand.hbm [shape: f32[16,32], index: 2, kind: input, shape index: {}]   ;;  %s2797_s3 = inlined_call_operand.vmem [shape: f32[1,32], index: 3, kind: input, shape index: {}]   ;;  %s2798_s4 = inlined_call_operand.vmem [shape: f32[1,32], index: 4, kind: input, shape index: {}]   ;;  %s2799_s5 = inlined_call_operand.hbm [shape: f32[32,32], index: 5, kind: input, shape index: {}]   ;;  %s2800_s6 = inlined_call_operand.vmem [shape: f32[1,32], index: 6, kind: input, shape index: {}]   ;;  %s2801_s7 = inlined_call_operand.vmem [shape: f32[1,32], index: 7, kind: input, shape index: {}]   ;;  %s2802_s8 = inlined_call_operand.hbm [shape: f32[32,64], index: 8, kind: input, shape index: {}]   ;;  %s2803_s9 = inlined_call_operand.vmem [shape: f32[1,64], index: 9, kind: input, shape index: {}]   ;;  %s2804_s10 = inlined_call_operand.vmem [shape: f32[1,64], index: 10, kind: input, shape index: {}]   ;;  %s2805_s11 = inlined_call_operand.vmem [shape: f32[64,64], index: 11, kind: input, shape index: {}]   ;;  %s2806_s12 = inlined_call_operand.vmem [shape: f32[1,64], index: 12, kind: input, shape index: {}]   ;;  %s2807_s13 = inlined_call_operand.vmem [shape: f32[1,64], index: 13, kind: input, shape index: {}]   ;;  %s2808_s14 = inlined_call_operand.vmem [shape: f32[128,64], index: 14, kind: input, shape index: {}]   ;;  %s2809_s15 = inlined_call_operand.vmem [shape: f32[1,64], index: 15, kind: input, shape index: {}]   ;;  %s2810_s16 = inlined_call_operand.vmem [shape: f32[1,64], index: 16, kind: input, shape index: {}]   ;;  %s2811_s17 = inlined_call_operand.vmem [shape: f32[128,128], index: 17, kind: input, shape index: {}]   ;;  %s2812_s18 = inlined_call_operand.vmem [shape: f32[1,128], index: 18, kind: input, shape index: {}]   ;;  %s2813_s19 = inlined_call_operand.vmem [shape: f32[1,128], index: 19, kind: input, shape index: {}]   ;;  %s2814_s20 = inlined_call_operand.hbm [shape: f32[2,8,128], index: 20, kind: output, shape index: {}]  }
   0x1   :  { %2827 = sst [smem:[#allocation21_spill]] %s2794_s0 }
   0x2   :  { %2828 = sst [smem:[#allocation22_spill]] %s2795_s1 }
   0x3   :  { %2829 = sst [smem:[#allocation23_spill]] %s2796_s2 }
   0x4   :  { %2830 = sst [smem:[#allocation24_spill]] %s2797_s3 }
   0x5   :  { %2831 = sst [smem:[#allocation25_spill]] %s2798_s4 }
   0x6   :  { %2832 = sst [smem:[#allocation26_spill]] %s2799_s5 }
   0x7   :  { %2833 = sst [smem:[#allocation27_spill]] %s2802_s8 }
   0x8   :  { %2834 = sst [smem:[#allocation28_spill]] %s2812_s18 }
   0x9   :  { %2835 = sst [smem:[#allocation29_spill]] %s2813_s19 }
   0xa   :  { %2836 = sst [smem:[#allocation30_spill]] %s2814_s20 }
   0xb   :  { %25 = vsyncpa [#allocation3], 0 }
   0xc   :  { %27 = vsyncpa [#allocation3 + $0x1], 0 }
   0xd   :  { %28 = vsyncpa [#allocation6], 0 }
   0xe   :  { %29 = vsyncpa [#allocation9], 0 }
   0xf   :  { %30 = vsyncpa [#allocation4], 0 }
  0x10   :  { %32 = vsyncpa [#allocation4 + $0x1], 0  ;;  %s2338_s1 = smov 0   ;;  %s2340_s22 = smov 0  }
  0x11   :  { %s2342_s23 = smov 0   ;;  %s2344_s24 = smov 0  }
  0x12 LB: > { %2837 = sst [smem:[#allocation15_spill]] %s2209_s1  ;;  %s2359_s2 = sadd.s32 4294967295, %s2221_s24   ;;  %s2221_s24 = sphi %s2344_s24, %s2872_s24   ;;  %s2217_s23 = sphi %s2342_s23, %s2874_s23   ;;  %s2213_s22 = sphi %s2340_s22, %s2876_s22   ;;  %s2209_s1 = sphi %s2338_s1, %s2875_s1  }
  0x13   : > { %2838 = sst [smem:[#allocation16_spill]] %s2217_s23  ;;  %s1736_s25 = sadd.s32 4294967294, %s2221_s24  }
  0x14   : > { %2839 = sst [smem:[#allocation17_spill]] %s2221_s24  ;;  %p84_p0 = scmp.ne.s32.totalorder %s2213_s22, %s2209_s1 }
  0x15   : > { %p2819_p1 = scmp.eq.s32.totalorder %s2359_s2, 0  ;;  %p492_p3 = scmp.eq.s32.totalorder %s1736_s25, 1 }
  0x16   : > { %p1737_p5 = scmp.ge.s32.totalorder %s2221_s24, 1  ;;  %p499_p7 = scmp.lt.s32.totalorder %s2221_s24, 3 }
  0x17   : > { %p2368_p4 = por %p2819_p1, %p84_p0  ;;  %p2373_p6 = por %p492_p3, %p84_p0 }
  0x18   : > { %p2378_p8 = pnand %p1737_p5, %p499_p7  ;;  %s2223_s28 = smov [#allocation5]  }
  0x19   : > { %s2840_s3 = scalar_select %p2368_p4, 1, 0 }
  0x1a   : > { %s2841_s26 = scalar_select %p2373_p6, 1, 0 }
  0x1b   : > { %s2843_s27 = scalar_select %p2378_p8, 1, 0 }
  0x1c   : > { %2842 = sst [smem:[#allocation18_spill]] %s2841_s26  ;;  %s511_s4 = sshll.u32 %s2223_s28, 4  ;;  %s512_s4 = int_to_ptr.vmem [resolvable:$true] %s511_s4 }
  0x1d   : > { %p1965_p9 = pneg %p2378_p8  ;;  %s2224_s30 = smov [#allocation7]  }
  0x1e   : > { %s530_s0 = sshll.u32 %s2224_s30, 4  ;;  %s2225_s21 = smov [#allocation8]   ;;  %s531_s0 = int_to_ptr.vmem [resolvable:$true] %s530_s0 }
  0x1f   : > { %p2387_p11 = pnand %p1965_p9, %p2819_p1  ;;  %s549_s25 = sshll.u32 %s2225_s21, 4  ;;  %s550_s25 = int_to_ptr.vmem [resolvable:$true] %s549_s25 }
  0x20   : > { %s2054_s26 = scalar_lea.vmem %s512_s4, 256  ;;  %p2062_p5 = scmp.lt.s32.totalorder %s512_s4, %s512_s4 }
  0x21   : > { %p2045_p12 = pneg %p2387_p11  ;;  %p2055_p13 = scmp.ne.s32.totalorder %s512_s4, %s2054_s26 }
  0x22   : > { %p2063_p7 = scmp.lt.s32.totalorder %s2054_s26, %s2054_s26 }
  0x23   : > { %p2057_p0 = pnand %p2055_p13, %p2045_p12 }
  0x24   : > { %p2064_p9 = por %p2063_p7, %p2062_p5 }
  0x25   : > { %p2058_p3 = pneg %p2057_p0 }
  0x27   : > { %p2065_p10 = pnand %p2064_p9, %p2058_p3 }
  0x29   : > { %2068 = shalt.err (!%p2065_p10)
}
  0x2a   : > { %s2226_s28 = smov 128   ;;  %s2227_s30 = smov 8  }
  0x2b   : > { %s2845_s20 = sld [smem:[#allocation23_spill]]  ;;  %s2080_s19 = scalar_lea.vmem %s531_s0, 512 }
  0x2c   : > { %p2081_p1 = scmp.ne.s32.totalorder %s531_s0, %s2080_s19  ;;  %p2088_p2 = scmp.lt.s32.totalorder %s531_s0, %s531_s0 }
  0x2d   : > { %p2089_p6 = scmp.lt.s32.totalorder %s2080_s19, %s2080_s19 }
  0x2e   : > { %p2083_p13 = pnand %p2081_p1, %p2045_p12 }
  0x2f   : > { %p2090_p5 = por %p2089_p6, %p2088_p2 }
  0x30   : > { %p2084_p0 = pneg %p2083_p13 }
  0x31   : > { %1968 = dma.hbm_to_vmem [thread:$0]  (!%p2387_p11), %s2845_s20, 256, %s512_s4, [#allocation6], %s2226_s28, %s2226_s28, %s2227_s30  }
  0x32   : > { %p2091_p3 = pnand %p2090_p5, %p2084_p0 }
  0x34   : > { %2094 = shalt.err (!%p2091_p3)
}
  0x35   : > { %s2846_s5 = sld [smem:[#allocation26_spill]]  ;;  %s2106_s20 = scalar_lea.vmem %s550_s25, 512 }
  0x36   : > { %p2107_p10 = scmp.ne.s32.totalorder %s550_s25, %s2106_s20  ;;  %p2114_p9 = scmp.lt.s32.totalorder %s550_s25, %s550_s25 }
  0x37   : > { %p2115_p13 = scmp.lt.s32.totalorder %s2106_s20, %s2106_s20 }
  0x38   : > { %p2109_p7 = pnand %p2107_p10, %p2045_p12 }
  0x39   : > { %p2116_p4 = por %p2115_p13, %p2114_p9 }
  0x3a   : > { %p2110_p1 = pneg %p2109_p7 }
  0x3b   : > { %1971 = dma.hbm_to_vmem [thread:$0]  (!%p2387_p11), %s2846_s5, 512, %s531_s0, [#allocation6], %s2226_s28, %s2226_s28, %s2227_s30  }
  0x3c   : > { %p2117_p2 = pnand %p2116_p4, %p2110_p1 }
  0x3e   : > { %2120 = shalt.err (!%p2117_p2)
}
  0x3f   : > { %s2847_s8 = sld [smem:[#allocation27_spill]]  ;;  %s2418_s18 = sadd.s32 1, %s2221_s24  }
  0x40   : > { %2848 = sst [smem:[#allocation19_spill]] %s2418_s18  ;;  %s68_s4 = ssub.s32 %s2221_s24, %s2418_s18 }
  0x41   : > { %s71_s29 = sadd.s32 1, %s2217_s23  ;;  %p69_p4 = scmp.eq.s32.totalorder %s68_s4, 0 }
  0x42   : > { %p78_p6 = scmp.ne.s32.totalorder %s2217_s23, %s2213_s22  ;;  %p79_p12 = scmp.eq.s32.totalorder %s2221_s24, 0 }
  0x43   : > { %p1986_p0 = scmp.lt.s32.totalorder %s2221_s24, 2  ;;  %p2850_p3 = scmp.eq.s32.totalorder %s2359_s2, 1 }
  0x44   : > { %s2428_s0 = scalar_select %p69_p4, %s2217_s23, %s71_s29  }
  0x45   : > { %1974 = dma.hbm_to_vmem [thread:$0]  (!%p2387_p11), %s2847_s8, 512, %s550_s25, [#allocation9], %s2226_s28, %s2226_s28, %s2227_s30  }
  0x46   : > { %2849 = sst [smem:[#allocation20_spill]] %s2428_s0  ;;  %p80_p5 = por %p79_p12, %p78_p6 }
  0x47   : > { %p2432_p10 = por %p2850_p3, %p78_p6  ;;  %s603_s26 = sand.u32 1, %s2217_s23  }
  0x48   : > { %s1743_s20 = sshll.u32 %s2221_s24, 7  ;;  %s1742_s25 = sshll.u32 %s603_s26, 3 }
  0x49   : > { %s2851_s21 = scalar_select %p2432_p10, 1, 0 }
  0x4a   : > { %s2852_s19 = sld [smem:[#allocation22_spill]]  ;;  %s607_s4 = scalar_lea.vmem [#allocation2], %s1742_s25 }
  0x4b   : > { %s614_s29 = sshll.u32 %s607_s4, 4  ;;  %p2443_p11 = pnand %p1986_p0, %p80_p5  ;;  %s615_s29 = int_to_ptr.vmem [resolvable:$true] %s614_s29 }
  0x4c   : > { %s604_s8 = scalar_lea.sflag [#allocation3], %s603_s26 }
  0x4d   : > { %p2123_p1 = pneg %p2443_p11 }
  0x50   : > { %s2441_s1 = scalar_lea.hbm %s2852_s19, %s1743_s20  ;;  %s2126_s30 = scalar_lea.hbm %s2852_s19, 256 }
  0x51   : > { %s2121_s0 = scalar_lea.hbm %s2441_s1, 128  ;;  %p2127_p2 = scmp.lt.s32.totalorder %s2441_s1, %s2852_s19 }
  0x52   : > { %p2122_p7 = scmp.ne.s32.totalorder %s2441_s1, %s2121_s0  ;;  %p2128_p4 = scmp.lt.s32.totalorder %s2126_s30, %s2121_s0 }
  0x54   : > { %p2124_p9 = pnand %p2123_p1, %p2122_p7  ;;  %p2129_p6 = por %p2128_p4, %p2127_p2 }
  0x56   : > { %p2125_p13 = pneg %p2124_p9 }
  0x58   : > { %p2130_p12 = pnand %p2129_p6, %p2125_p13 }
  0x5a   : > { %2133 = shalt.err (!%p2130_p12)
}
  0x5b   : > { %s2134_s4 = scalar_lea.vmem %s615_s29, 128  ;;  %s2228_s26 = smov [#allocation2]  }
  0x5c   : > { %p2135_p0 = scmp.ne.s32.totalorder %s615_s29, %s2134_s4  ;;  %s2139_s18 = sshll.u32 %s2228_s26, 4  ;;  %s2140_s18 = int_to_ptr.vmem [resolvable:$false] %s2139_s18 }
  0x5d   : > { %s2141_s24 = scalar_lea.vmem %s2140_s18, 256  ;;  %p2142_p7 = scmp.lt.s32.totalorder %s615_s29, %s2140_s18 }
  0x5e   : > { %p2137_p5 = pnand %p2135_p0, %p2123_p1  ;;  %p2143_p9 = scmp.lt.s32.totalorder %s2141_s24, %s2134_s4 }
  0x60   : > { %p2138_p3 = pneg %p2137_p5  ;;  %p2144_p10 = por %p2143_p9, %p2142_p7 }
  0x62   : > { %p2145_p8 = pnand %p2144_p10, %p2138_p3 }
  0x64   : > { %2148 = shalt.err (!%p2145_p8)
}
  0x65   : > { %1978 = dma.hbm_to_vmem [thread:$0]  (!%p2443_p11), %s2441_s1, 128, %s615_s29, %s604_s8  }
  0x66   : > { %p2854_p13 = scmp.ne.s32.totalorder %s2843_s27, 0 }
  0x67   : > { %s2464_s23 = sand.u32 (!%p2854_p13), 1, %s2213_s22   ;;  %p2855_p8 = scmp.ne.s32.totalorder (!%p2854_p13), %s2840_s3, 0 }
  0x68   : > { %623 = sbr.rel (%p2854_p13) target bundleno = 2214 (0x8a6), region = 100  ;;  %s1745_s0 = sshll.u32 (!%p2854_p13), %s2464_s23, 3 }
  0x69   : > { %s626_s18 = scalar_lea.sflag (!%p2854_p13), [#allocation3], %s2464_s23  ;;  %s2470_s24 = scalar_lea.vmem (!%p2854_p13), [#allocation2], %s1745_s0 }
  0x6d   : > { %2192 = dma.done.wait (%p2855_p8), %s626_s18, 128  }
  0x6e   : > { %2194 = vsyncadd (%p2855_p8), %s626_s18, 4294967168  ;;  %p2856_p10 = scmp.eq.s32.totalorder %s2359_s2, 0 }
  0x70   : > { %2196 = dma.done.wait (%p2856_p10), [#allocation6], 768   ;;  %p2857_p11 = pmov %p2856_p10 }
  0x71   : > { %p2858_p1 = pmov %p2856_p10 }
  0x72   : > { %2198 = vsyncadd (%p2857_p11), [#allocation6], 4294966528 }
  0x73   : > { %2200 = dma.done.wait (%p2858_p1), [#allocation9], 512   ;;  %p2859_p2 = pmov %p2858_p1 }
  0x74   : > { %p702_p4 = scmp.lt.s32.totalorder %s2359_s2, 1  ;;  %v2229_v0 = vmov 0.0   ;;  %vm2230_vm0 = vmmov 0   ;;  %s2860_s1 = sld [smem:[#allocation21_spill]]  ;;  %v709_v1 = vld [vmem:[#allocation5 + $0x8] sm:$0xff]  ;;  %v708_v2 = vld [vmem:[#allocation5] sm:$0xff]  ;;  %v814_v31 = vlaneseq }
  0x75   : > { %2202 = vsyncadd (%p2859_p2), [#allocation9], 4294966784  ;;  %1821 = vmatprep.subr.mxu0 %v2229_v0  ;;  %1825 = vmatprep.mubr.msk.f32.mxu0 %vm2230_vm0, %v2229_v0  ;;  %vm710_vm1 = vcmask 130048   ;;  %v833_v4 = vld [vmem:[#allocation7 + $0x18] sm:$0xff]  ;;  %v832_v5 = vld [vmem:[#allocation7 + $0x10] sm:$0xff]  ;;  %vm786_vm2 = vcmask 261120  }
  0x76   : > { %s703_s5 = scalar_select %p702_p4, %s2359_s2, 1  ;;  %1850 = vmatprep.subr.mxu1 %v2229_v0  ;;  %1866 = vmatprep.mubr.msk.f32.mxu1 %vm2230_vm0, %v2229_v0  ;;  %v831_v6 = vld [vmem:[#allocation7 + $0x8] sm:$0xff]  ;;  %v830_v7 = vld [vmem:[#allocation7] sm:$0xff]  ;;  %v815_v32 = vshrl.u32 %v814_v31, 7  ;;  %v954_v46 = vld [vmem:[#allocation8 + $0x18] sm:$0xff]  ;;  %vm1030_vm5 = vcmask 523264  }
  0x77   : > { %1822 = vmatpush3.msra.mxu0 %v709_v1  ;;  %s2861_s30 = sld [smem:[#allocation24_spill]]  ;;  %v953_v47 = vld [vmem:[#allocation8 + $0x10] sm:$0xff]  ;;  %v952_v48 = vld [vmem:[#allocation8 + $0x8] sm:$0xff]  ;;  %v951_v49 = vld [vmem:[#allocation8] sm:$0xff]  ;;  %vm1198_vm8 = vcmask 64512   ;;  %s1758_s28 = sshll.u32 %s2359_s2, 7 }
  0x78   : > { %s1750_s8 = sshll.u32 %s703_s5, 3  ;;  %1823 = vmatprep.subr.mxu0 %v2229_v0  ;;  %v2508_v34 = vsub.s32 0, %v815_v32  ;;  %s2862_s26 = sld [smem:[#allocation25_spill]] }
  0x79   : > { %1824 = vmatpush3.msra.mxu0 %v708_v2  ;;  %s2863_s27 = sld [smem:[#allocation28_spill]]  ;;  %p2866_p12 = scmp.ne.s32.totalorder %s2851_s21, 0 }
  0x7a   : > { %s705_s29 = scalar_lea.vmem %s2860_s1, %s1750_s8  ;;  %1828 = vmatprep.subr.mxu0 %v2229_v0  ;;  %s2864_s20 = sld [smem:[#allocation29_spill]] }
  0x7b   : > { %v707_v3 = vld [vmem:[%s705_s29] sm:$0xff]  ;;  %s2865_s18 = sld [smem:[#allocation30_spill]]  ;;  %s1612_s8 = scalar_lea.sflag [#allocation4], %s2464_s23 }
  0x7c   : > { %1826 = vmatmul.mubr.msk.f32.vlgmr.msra.gmra.mxu0 %vm710_vm1, %v707_v3  ;;  %s2232_s2 = smov [#allocation10]  }
  0x7d   : > { %1836 = vmatprep.mubr.msk.f32.mxu0 %vm2230_vm0, %v2229_v0  ;;  %1829 = vmatpush3.msra.mxu0 %v833_v4  ;;  %v784_v33 = vld [vmem:[%s2861_s30] sm:$0x1]  ;;  %s701_s30 = scalar_lea.vmem [#allocation10], %s1745_s0  ;;  %s2153_s3 = sshll.u32 %s2232_s2, 4  ;;  %s2154_s3 = int_to_ptr.vmem [resolvable:$false] %s2153_s3 }
  0x7e   : > { %1830 = vmatprep.subr.mxu0 %v2229_v0  ;;  %v785_v37 = vld [vmem:[%s2862_s26] sm:$0x1]  ;;  %s1625_s25 = sshll.u32 %s701_s30, 4  ;;  %s2155_s0 = scalar_lea.vmem %s2154_s3, 256  ;;  %s1626_s25 = int_to_ptr.vmem [resolvable:$true] %s1625_s25 }
  0x7f   : > { %1831 = vmatpush3.msra.mxu0 %v832_v5  ;;  %p2156_p3 = scmp.lt.s32.totalorder %s1626_s25, %s2154_s3 }
  0x80   : > { %1832 = vmatprep.subr.mxu0 %v2229_v0 }
  0x81   : > { %1833 = vmatpush3.msra.mxu0 %v831_v6  ;;  %s2757_s5 = scalar_lea.hbm %s2865_s18, %s1758_s28 }
  0x82   : > { %1834 = vmatprep.subr.mxu0 %v2229_v0 }
  0x83   : > { %1835 = vmatpush3.msra.mxu0 %v830_v7 }
  0x84   : > { %1839 = vmatprep.subr.mxu0 %v2229_v0 }
 0x13c   : > { %v780_v8 = vpop.f32.mrf.mxu0 }
 0x13d   : > { %v787_v9 = vsel %vm786_vm2, %v780_v8, 0.0  ;;  %v796_v10 = vmul.f32 %v780_v8, %v780_v8 }
 0x13e   : > { %v788_v11 = vrot.slane %v787_v9, 4  ;;  %v1827_v12 = vpop.f32.mrf.mxu0 }
 0x13f   : > { %v797_v13 = vsel %vm786_vm2, %v796_v10, 0.0  ;;  %v907_v10 = vld [vmem:[%s2800_s6] sm:$0x1] }
 0x140   : > { %v789_v14 = vadd.f32 %v788_v11, %v787_v9  ;;  %v798_v15 = vrot.slane %v797_v13, 4 }
 0x142   : > { %v790_v16 = vrot.slane %v789_v14, 2  ;;  %v799_v17 = vadd.f32 %v798_v15, %v797_v13  ;;  %v908_v13 = vld [vmem:[%s2801_s7] sm:$0x1] }
 0x144   : > { %v791_v18 = vadd.f32 %v790_v16, %v789_v14  ;;  %v800_v19 = vrot.slane %v799_v17, 2 }
 0x146   : > { %v792_v20 = vrot.slane %v791_v18, 1  ;;  %v801_v21 = vadd.f32 %v800_v19, %v799_v17 }
 0x148   : > { %v793_v22 = vadd.f32 %v792_v20, %v791_v18  ;;  %v802_v23 = vrot.slane %v801_v21, 1 }
 0x14a   : > { %v795_v24 = vmul.f32 0.125, %v793_v22  ;;  %v803_v25 = vadd.f32 %v802_v23, %v801_v21  ;;  %v1080_v22 = vld [vmem:[%s2805_s11 + $0x38] sm:$0xff]  ;;  %v1079_v23 = vld [vmem:[%s2805_s11 + $0x30] sm:$0xff] }
 0x14b   : > { %1851 = vmatpush3.msra.mxu1 %v1080_v22 }
 0x14c   : > { %v804_v26 = vmul.f32 0.125, %v803_v25  ;;  %v805_v27 = vmul.f32 %v795_v24, %v795_v24  ;;  %1852 = vmatprep.subr.mxu1 %v2229_v0  ;;  %v1077_v25 = vld [vmem:[%s2805_s11 + $0x20] sm:$0xff] }
 0x14d   : > { %1853 = vmatpush3.msra.mxu1 %v1079_v23 }
 0x14e   : > { %v806_v28 = vsub.f32 %v804_v26, %v805_v27  ;;  %1854 = vmatprep.subr.mxu1 %v2229_v0  ;;  %v1076_v26 = vld [vmem:[%s2805_s11 + $0x18] sm:$0xff]  ;;  %v1075_v27 = vld [vmem:[%s2805_s11 + $0x10] sm:$0xff] }
 0x150   : > { %v807_v29 = vmax.f32 %v806_v28, 0.0  ;;  %v1074_v28 = vld [vmem:[%s2805_s11 + $0x8] sm:$0xff] }
 0x152   : > { %v808_v30 = vadd.f32 1e-05, %v807_v29  ;;  %v1073_v29 = vld [vmem:[%s2805_s11] sm:$0xff] }
 0x154   : > { %2031 = vrsqrt.f32 %v808_v30 }
 0x161   : > { %v2032_v35 = vpop.eup %2031 }
 0x162   : > { %v810_v36 = vmul.f32 %v2032_v35, %v784_v33 }
 0x164   : > { %v811_v38 = vmul.f32 %v810_v36, %v795_v24  ;;  %v817_v39 = vrot.slane %v810_v36, %v2508_v34  ;;  %v1078_v24 = vld [vmem:[%s2805_s11 + $0x28] sm:$0xff] }
 0x165   : > { %1855 = vmatpush3.msra.mxu1 %v1078_v24 }
 0x166   : > { %v812_v40 = vsub.f32 %v785_v37, %v811_v38  ;;  %v819_v41 = vmul.f32 %v817_v39, %v780_v8  ;;  %1856 = vmatprep.subr.mxu1 %v2229_v0 }
 0x167   : > { %1857 = vmatpush3.msra.mxu1 %v1077_v25 }
 0x168   : > { %v824_v42 = vrot.slane %v812_v40, %v2508_v34  ;;  %1858 = vmatprep.subr.mxu1 %v2229_v0 }
 0x169   : > { %1859 = vmatpush3.msra.mxu1 %v1076_v26  ;;  %v1154_v26 = vld [vmem:[%s2806_s12] sm:$0x1] }
 0x16a   : > { %v826_v43 = vadd.f32 %v824_v42, %v819_v41  ;;  %1860 = vmatprep.subr.mxu1 %v2229_v0 }
 0x16b   : > { %1861 = vmatpush3.msra.mxu1 %v1075_v27 }
 0x16c   : > { %v828_v44 = vmul.f32 0.01, %v826_v43  ;;  %vm827_vm3 = vcmp.gt.f32.partialorder %v826_v43, 0.0  ;;  %1862 = vmatprep.subr.mxu1 %v2229_v0 }
 0x16d   : > { %1863 = vmatpush3.msra.mxu1 %v1074_v28 }
 0x16e   : > { %v829_v45 = vsel %vm827_vm3, %v826_v43, %v828_v44  ;;  %1864 = vmatprep.subr.mxu1 %v2229_v0 }
 0x16f   : > { %1837 = vmatmul.mubr.msk.f32.vlgmr.msra.gmra.mxu0 %vm786_vm2, %v829_v45  ;;  %1865 = vmatpush3.msra.mxu1 %v1073_v29  ;;  %v1155_v29 = vld [vmem:[%s2807_s13] sm:$0x1] }
 0x170   : > { %1847 = vmatprep.mubr.msk.f32.mxu0 %vm2230_vm0, %v2229_v0  ;;  %1840 = vmatpush3.msra.mxu0 %v954_v46 }
 0x171   : > { %1841 = vmatprep.subr.mxu0 %v2229_v0  ;;  %1909 = vmatprep.subr.mxu1 %v2229_v0 }
 0x172   : > { %1842 = vmatpush3.msra.mxu0 %v953_v47 }
 0x173   : > { %1843 = vmatprep.subr.mxu0 %v2229_v0 }
 0x174   : > { %1844 = vmatpush3.msra.mxu0 %v952_v48 }
 0x175   : > { %1845 = vmatprep.subr.mxu0 %v2229_v0 }
 0x176   : > { %1846 = vmatpush3.msra.mxu0 %v951_v49 }
 0x177   : > { %1869 = vmatprep.subr.mxu0 %v2229_v0 }
 0x22f   : > { %v903_v50 = vpop.f32.mrf.mxu0 }
 0x230   : > { %v909_v51 = vsel %vm786_vm2, %v903_v50, 0.0  ;;  %v917_v52 = vmul.f32 %v903_v50, %v903_v50 }
 0x231   : > { %v910_v53 = vrot.slane %v909_v51, 4  ;;  %v1838_v54 = vpop.f32.mrf.mxu0 }
 0x232   : > { %v918_v55 = vsel %vm786_vm2, %v917_v52, 0.0  ;;  %v1028_v54 = vld [vmem:[%s2803_s9] sm:$0x1] }
 0x233   : > { %v911_v56 = vadd.f32 %v910_v53, %v909_v51  ;;  %v919_v57 = vrot.slane %v918_v55, 4 }
 0x235   : > { %v912_v58 = vrot.slane %v911_v56, 2  ;;  %v920_v59 = vadd.f32 %v919_v57, %v918_v55  ;;  %v1029_v57 = vld [vmem:[%s2804_s10] sm:$0x1] }
 0x237   : > { %v913_v60 = vadd.f32 %v912_v58, %v911_v56  ;;  %v921_v61 = vrot.slane %v920_v59, 2 }
 0x239   : > { %v914_v62 = vrot.slane %v913_v60, 1  ;;  %v922_v63 = vadd.f32 %v921_v61, %v920_v59 }
 0x23b   : > { %v915_v1 = vadd.f32 %v914_v62, %v913_v60  ;;  %v923_v2 = vrot.slane %v922_v63, 1 }
 0x23d   : > { %v916_v3 = vmul.f32 0.125, %v915_v1  ;;  %v924_v4 = vadd.f32 %v923_v2, %v922_v63 }
 0x23f   : > { %v925_v5 = vmul.f32 0.125, %v924_v4  ;;  %v926_v6 = vmul.f32 %v916_v3, %v916_v3 }
 0x241   : > { %v927_v7 = vsub.f32 %v925_v5, %v926_v6 }
 0x243   : > { %v928_v8 = vmax.f32 %v927_v7, 0.0 }
 0x245   : > { %v929_v9 = vadd.f32 1e-05, %v928_v8 }
 0x247   : > { %2033 = vrsqrt.f32 %v929_v9 }
 0x254   : > { %v2034_v11 = vpop.eup %2033 }
 0x255   : > { %v931_v12 = vmul.f32 %v2034_v11, %v907_v10 }
 0x257   : > { %v932_v14 = vmul.f32 %v931_v12, %v916_v3  ;;  %v938_v15 = vrot.slane %v931_v12, %v2508_v34 }
 0x259   : > { %v933_v16 = vsub.f32 %v908_v13, %v932_v14  ;;  %v940_v17 = vmul.f32 %v938_v15, %v903_v50 }
 0x25b   : > { %v945_v18 = vrot.slane %v933_v16, %v2508_v34 }
 0x25d   : > { %v947_v19 = vadd.f32 %v945_v18, %v940_v17 }
 0x25f   : > { %v949_v20 = vmul.f32 0.01, %v947_v19  ;;  %vm948_vm4 = vcmp.gt.f32.partialorder %v947_v19, 0.0 }
 0x261   : > { %v950_v21 = vsel %vm948_vm4, %v947_v19, %v949_v20 }
 0x262   : > { %1848 = vmatmul.mubr.msk.f32.vlgmr.msra.gmra.mxu0 %vm786_vm2, %v950_v21 }
 0x263   : > { %1871 = vmatprep.mubr.msk.f32.mxu0 %vm2230_vm0, %v2229_v0 }
 0x322   : > { %v1024_v30 = vpop.f32.mrf.mxu0 }
 0x323   : > { %v1031_v31 = vsel %vm1030_vm5, %v1024_v30, 0.0  ;;  %v1039_v32 = vmul.f32 %v1024_v30, %v1024_v30 }
 0x324   : > { %v1032_v33 = vrot.slane %v1031_v31, 4  ;;  %v1849_v35 = vpop.f32.mrf.mxu0 }
 0x325   : > { %v1040_v36 = vsel %vm1030_vm5, %v1039_v32, 0.0 }
 0x326   : > { %v1033_v37 = vadd.f32 %v1032_v33, %v1031_v31  ;;  %v1041_v38 = vrot.slane %v1040_v36, 4 }
 0x328   : > { %v1034_v39 = vrot.slane %v1033_v37, 2  ;;  %v1042_v40 = vadd.f32 %v1041_v38, %v1040_v36  ;;  %v2591_v38 = vld [vmem:[%s2470_s24] sm:$0xff]  ;;  %s2231_s24 = smov 64  }
 0x32a   : > { %v1035_v41 = vadd.f32 %v1034_v39, %v1033_v37  ;;  %v1043_v42 = vrot.slane %v1042_v40, 2 }
 0x32c   : > { %v1036_v43 = vrot.slane %v1035_v41, 1  ;;  %v1044_v44 = vadd.f32 %v1043_v42, %v1042_v40  ;;  %v1292_v40 = vld [vmem:[%s2808_s14 + $0x78] sm:$0xff]  ;;  %v1290_v42 = vld [vmem:[%s2808_s14 + $0x68] sm:$0xff] }
 0x32e   : > { %v1037_v45 = vadd.f32 %v1036_v43, %v1035_v41  ;;  %v1045_v46 = vrot.slane %v1044_v44, 1  ;;  %v1291_v41 = vld [vmem:[%s2808_s14 + $0x70] sm:$0xff]  ;;  %v1289_v43 = vld [vmem:[%s2808_s14 + $0x60] sm:$0xff] }
 0x330   : > { %v1038_v47 = vmul.f32 0.125, %v1037_v45  ;;  %v1046_v48 = vadd.f32 %v1045_v46, %v1044_v44  ;;  %v1288_v44 = vld [vmem:[%s2808_s14 + $0x58] sm:$0xff]  ;;  %v1287_v45 = vld [vmem:[%s2808_s14 + $0x50] sm:$0xff]  ;;  %v1286_v46 = vld [vmem:[%s2808_s14 + $0x48] sm:$0xff] }
 0x332   : > { %v1047_v49 = vmul.f32 0.125, %v1046_v48  ;;  %v1048_v50 = vmul.f32 %v1038_v47, %v1038_v47  ;;  %v1284_v48 = vld [vmem:[%s2808_s14 + $0x38] sm:$0xff] }
 0x334   : > { %v1049_v51 = vsub.f32 %v1047_v49, %v1048_v50  ;;  %v1283_v49 = vld [vmem:[%s2808_s14 + $0x30] sm:$0xff]  ;;  %v1282_v50 = vld [vmem:[%s2808_s14 + $0x28] sm:$0xff] }
 0x336   : > { %v1050_v52 = vmax.f32 %v1049_v51, 0.0  ;;  %v1281_v51 = vld [vmem:[%s2808_s14 + $0x20] sm:$0xff] }
 0x338   : > { %v1051_v53 = vadd.f32 1e-05, %v1050_v52  ;;  %v1280_v52 = vld [vmem:[%s2808_s14 + $0x18] sm:$0xff] }
 0x33a   : > { %2035 = vrsqrt.f32 %v1051_v53  ;;  %v1279_v53 = vld [vmem:[%s2808_s14 + $0x10] sm:$0xff] }
 0x347   : > { %v2036_v55 = vpop.eup %2035 }
 0x348   : > { %v1053_v56 = vmul.f32 %v2036_v55, %v1028_v54  ;;  %v1278_v54 = vld [vmem:[%s2808_s14 + $0x8] sm:$0xff]  ;;  %v1277_v55 = vld [vmem:[%s2808_s14] sm:$0xff] }
 0x34a   : > { %v1054_v58 = vmul.f32 %v1053_v56, %v1038_v47  ;;  %v1060_v59 = vrot.slane %v1053_v56, %v2508_v34  ;;  %v1285_v47 = vld [vmem:[%s2808_s14 + $0x40] sm:$0xff] }
 0x34c   : > { %v1055_v60 = vsub.f32 %v1029_v57, %v1054_v58  ;;  %v1062_v61 = vmul.f32 %v1060_v59, %v1024_v30 }
 0x34e   : > { %v1067_v62 = vrot.slane %v1055_v60, %v2508_v34 }
 0x350   : > { %v1069_v63 = vadd.f32 %v1067_v62, %v1062_v61 }
 0x352   : > { %vm1070_vm6 = vcmp.gt.f32.partialorder %v1069_v63, 0.0  ;;  %v1071_v1 = vmul.f32 0.01, %v1069_v63 }
 0x354   : > { %v1072_v2 = vsel %vm1070_vm6, %v1069_v63, %v1071_v1 }
 0x355   : > { %1867 = vmatmul.mubr.msk.f32.vlgmr.msra.gmra.mxu1 %vm1030_vm5, %v1072_v2 }
 0x356   : > { %1911 = vmatprep.mubr.msk.f32.mxu1 %vm2230_vm0, %v2229_v0 }
 0x415   : > { %v1150_v3 = vpop.f32.mrf.mxu1 }
 0x416   : > { %v1156_v4 = vsel %vm1030_vm5, %v1150_v3, 0.0  ;;  %v1164_v5 = vmul.f32 %v1150_v3, %v1150_v3 }
 0x417   : > { %v1157_v6 = vrot.slane %v1156_v4, 4  ;;  %v1868_v7 = vpop.f32.mrf.mxu1 }
 0x418   : > { %v1165_v8 = vsel %vm1030_vm5, %v1164_v5, 0.0 }
 0x419   : > { %v1158_v9 = vadd.f32 %v1157_v6, %v1156_v4  ;;  %v1166_v10 = vrot.slane %v1165_v8, 4 }
 0x41b   : > { %v1159_v11 = vrot.slane %v1158_v9, 2  ;;  %v1167_v12 = vadd.f32 %v1166_v10, %v1165_v8 }
 0x41d   : > { %v1160_v13 = vadd.f32 %v1159_v11, %v1158_v9  ;;  %v1168_v14 = vrot.slane %v1167_v12, 2 }
 0x41f   : > { %v1161_v15 = vrot.slane %v1160_v13, 1  ;;  %v1169_v16 = vadd.f32 %v1168_v14, %v1167_v12 }
 0x421   : > { %v1162_v17 = vadd.f32 %v1161_v15, %v1160_v13  ;;  %v1170_v18 = vrot.slane %v1169_v16, 1 }
 0x423   : > { %v1163_v19 = vmul.f32 0.125, %v1162_v17  ;;  %v1171_v20 = vadd.f32 %v1170_v18, %v1169_v16 }
 0x425   : > { %v1172_v21 = vmul.f32 0.125, %v1171_v20  ;;  %v1173_v22 = vmul.f32 %v1163_v19, %v1163_v19  ;;  %v1363_v20 = vld [vmem:[%s2809_s15] sm:$0x1] }
 0x427   : > { %v1174_v23 = vsub.f32 %v1172_v21, %v1173_v22 }
 0x429   : > { %v1175_v24 = vmax.f32 %v1174_v23, 0.0  ;;  %v1364_v23 = vld [vmem:[%s2810_s16] sm:$0x1] }
 0x42b   : > { %v1176_v25 = vadd.f32 1e-05, %v1175_v24 }
 0x42d   : > { %2037 = vrsqrt.f32 %v1176_v25 }
 0x43a   : > { %v2038_v27 = vpop.eup %2037 }
 0x43b   : > { %v1178_v28 = vmul.f32 %v2038_v27, %v1154_v26 }
 0x43d   : > { %v1179_v30 = vmul.f32 %v1178_v28, %v1163_v19  ;;  %v1185_v31 = vrot.slane %v1178_v28, %v2508_v34 }
 0x43f   : > { %v1180_v32 = vsub.f32 %v1155_v29, %v1179_v30  ;;  %v1187_v33 = vmul.f32 %v1185_v31, %v1150_v3 }
 0x441   : > { %v1192_v35 = vrot.slane %v1180_v32, %v2508_v34  ;;  %v1497_v32 = vld [vmem:[%s2811_s17 + $0x78] sm:$0xff] }
 0x443   : > { %v1194_v36 = vadd.f32 %v1192_v35, %v1187_v33  ;;  %v1496_v33 = vld [vmem:[%s2811_s17 + $0x70] sm:$0xff]  ;;  %v1495_v35 = vld [vmem:[%s2811_s17 + $0x68] sm:$0xff] }
 0x445   : > { %vm1195_vm7 = vcmp.gt.f32.partialorder %v1194_v36, 0.0  ;;  %v1196_v37 = vmul.f32 0.01, %v1194_v36 }
 0x447   : > { %v1197_v39 = vsel %vm1195_vm7, %v1194_v36, %v1196_v37  ;;  %v1494_v36 = vld [vmem:[%s2811_s17 + $0x60] sm:$0xff]  ;;  %v1493_v37 = vld [vmem:[%s2811_s17 + $0x58] sm:$0xff] }
 0x448   : > { %1870 = vmatpush3.msra.mxu0 %v1197_v39 }
 0x449   : > { %1872 = vmatmul.mubr.msk.f32.vlgmr.msra.gmra.mxu0 %vm1198_vm8, %v2591_v38  ;;  %1874 = vmatprep.subr.mxu0 %v2229_v0 }
 0x44a   : > { %1906 = vmatprep.mubr.msk.f32.mxu0 %vm2230_vm0, %v2229_v0  ;;  %1875 = vmatpush3.msra.mxu0 %v1292_v40  ;;  %v1490_v40 = vld [vmem:[%s2811_s17 + $0x40] sm:$0xff] }
 0x44b   : > { %1876 = vmatprep.subr.mxu0 %v2229_v0 }
 0x44c   : > { %1877 = vmatpush3.msra.mxu0 %v1291_v41  ;;  %v1489_v41 = vld [vmem:[%s2811_s17 + $0x38] sm:$0xff] }
 0x44d   : > { %1878 = vmatprep.subr.mxu0 %v2229_v0 }
 0x44e   : > { %1879 = vmatpush3.msra.mxu0 %v1290_v42  ;;  %v1488_v42 = vld [vmem:[%s2811_s17 + $0x30] sm:$0xff] }
 0x44f   : > { %1880 = vmatprep.subr.mxu0 %v2229_v0 }
 0x450   : > { %1881 = vmatpush3.msra.mxu0 %v1289_v43  ;;  %v1487_v43 = vld [vmem:[%s2811_s17 + $0x28] sm:$0xff] }
 0x451   : > { %1882 = vmatprep.subr.mxu0 %v2229_v0 }
 0x452   : > { %1883 = vmatpush3.msra.mxu0 %v1288_v44  ;;  %v1486_v44 = vld [vmem:[%s2811_s17 + $0x20] sm:$0xff] }
 0x453   : > { %1884 = vmatprep.subr.mxu0 %v2229_v0 }
 0x454   : > { %1885 = vmatpush3.msra.mxu0 %v1287_v45  ;;  %v1485_v45 = vld [vmem:[%s2811_s17 + $0x18] sm:$0xff] }
 0x455   : > { %1886 = vmatprep.subr.mxu0 %v2229_v0 }
 0x456   : > { %1887 = vmatpush3.msra.mxu0 %v1286_v46  ;;  %v1484_v46 = vld [vmem:[%s2811_s17 + $0x10] sm:$0xff] }
 0x457   : > { %1888 = vmatprep.subr.mxu0 %v2229_v0 }
 0x458   : > { %1889 = vmatpush3.msra.mxu0 %v1285_v47  ;;  %v1483_v47 = vld [vmem:[%s2811_s17 + $0x8] sm:$0xff] }
 0x459   : > { %1890 = vmatprep.subr.mxu0 %v2229_v0 }
 0x45a   : > { %1891 = vmatpush3.msra.mxu0 %v1284_v48  ;;  %v1482_v48 = vld [vmem:[%s2811_s17] sm:$0xff] }
 0x45b   : > { %1892 = vmatprep.subr.mxu0 %v2229_v0 }
 0x45c   : > { %1893 = vmatpush3.msra.mxu0 %v1283_v49 }
 0x45d   : > { %1894 = vmatprep.subr.mxu0 %v2229_v0 }
 0x45e   : > { %1895 = vmatpush3.msra.mxu0 %v1282_v50 }
 0x45f   : > { %1896 = vmatprep.subr.mxu0 %v2229_v0 }
 0x460   : > { %1897 = vmatpush3.msra.mxu0 %v1281_v51 }
 0x461   : > { %1898 = vmatprep.subr.mxu0 %v2229_v0 }
 0x462   : > { %1899 = vmatpush3.msra.mxu0 %v1280_v52 }
 0x463   : > { %1900 = vmatprep.subr.mxu0 %v2229_v0 }
 0x464   : > { %1901 = vmatpush3.msra.mxu0 %v1279_v53 }
 0x465   : > { %1902 = vmatprep.subr.mxu0 %v2229_v0 }
 0x466   : > { %1903 = vmatpush3.msra.mxu0 %v1278_v54 }
 0x467   : > { %1904 = vmatprep.subr.mxu0 %v2229_v0 }
 0x468   : > { %1905 = vmatpush3.msra.mxu0 %v1277_v55 }
 0x509   : > { %v1268_v56 = vpop.f32.mrf.mxu0 }
 0x50a   : > { %1273 = vrot.lane.b32.xlu0 %v1268_v56, %s2231_s24 }
 0x50b   : > { %v1873_v57 = vpop.f32.mrf.mxu0 }
 0x57c   : > { %v1274_v58 = vpop.permute.xlu0 %1273 }
 0x57d   : > { %v1276_v59 = vsel %vm1030_vm5, %v1197_v39, %v1274_v58  ;;  %v1491_v39 = vld [vmem:[%s2811_s17 + $0x48] sm:$0xff] }
 0x57e   : > { %1907 = vmatmul.mubr.f32.vlgmr.msra.gmra.mxu0 %v1276_v59 }
 0x63e   : > { %v1359_v60 = vpop.f32.mrf.mxu0 }
 0x63f   : > { %v1365_v61 = vsel %vm1030_vm5, %v1359_v60, 0.0  ;;  %v1373_v62 = vmul.f32 %v1359_v60, %v1359_v60 }
 0x640   : > { %v1366_v63 = vrot.slane %v1365_v61, 4  ;;  %v1908_v1 = vpop.f32.mrf.mxu0 }
 0x641   : > { %v1374_v2 = vsel %vm1030_vm5, %v1373_v62, 0.0 }
 0x642   : > { %v1367_v3 = vadd.f32 %v1366_v63, %v1365_v61  ;;  %v1375_v4 = vrot.slane %v1374_v2, 4 }
 0x644   : > { %v1368_v5 = vrot.slane %v1367_v3, 2  ;;  %v1376_v6 = vadd.f32 %v1375_v4, %v1374_v2 }
 0x646   : > { %v1369_v7 = vadd.f32 %v1368_v5, %v1367_v3  ;;  %v1377_v8 = vrot.slane %v1376_v6, 2 }
 0x648   : > { %v1370_v9 = vrot.slane %v1369_v7, 1  ;;  %v1378_v10 = vadd.f32 %v1377_v8, %v1376_v6 }
 0x64a   : > { %v1371_v11 = vadd.f32 %v1370_v9, %v1369_v7  ;;  %v1379_v12 = vrot.slane %v1378_v10, 1 }
 0x64c   : > { %v1372_v13 = vmul.f32 0.125, %v1371_v11  ;;  %v1380_v14 = vadd.f32 %v1379_v12, %v1378_v10  ;;  %v1568_v10 = vld [vmem:[%s2863_s27] sm:$0x1] }
 0x64e   : > { %v1381_v15 = vmul.f32 0.125, %v1380_v14  ;;  %v1382_v16 = vmul.f32 %v1372_v13, %v1372_v13 }
 0x650   : > { %v1383_v17 = vsub.f32 %v1381_v15, %v1382_v16 }
 0x652   : > { %v1384_v18 = vmax.f32 %v1383_v17, 0.0 }
 0x654   : > { %v1385_v19 = vadd.f32 1e-05, %v1384_v18 }
 0x656   : > { %2039 = vrsqrt.f32 %v1385_v19 }
 0x663   : > { %v2040_v21 = vpop.eup %2039 }
 0x664   : > { %v1387_v22 = vmul.f32 %v2040_v21, %v1363_v20 }
 0x666   : > { %v1388_v24 = vmul.f32 %v1387_v22, %v1372_v13  ;;  %v1394_v25 = vrot.slane %v1387_v22, %v2508_v34  ;;  %v1569_v13 = vld [vmem:[%s2864_s20] sm:$0x1] }
 0x668   : > { %v1389_v26 = vsub.f32 %v1364_v23, %v1388_v24  ;;  %v1396_v27 = vmul.f32 %v1394_v25, %v1359_v60 }
 0x66a   : > { %v1401_v28 = vrot.slane %v1389_v26, %v2508_v34 }
 0x66c   : > { %v1403_v29 = vadd.f32 %v1401_v28, %v1396_v27 }
 0x66e   : > { %vm1404_vm9 = vcmp.gt.f32.partialorder %v1403_v29, 0.0  ;;  %v1405_v30 = vmul.f32 0.01, %v1403_v29 }
 0x670   : > { %v1406_v31 = vsel %vm1404_vm9, %v1403_v29, %v1405_v30 }
 0x671   : > { %1910 = vmatpush3.msra.mxu1 %v1406_v31 }
 0x672   : > { %1912 = vmatmul.mubr.msk.f32.vlgmr.msra.gmra.mxu1 %vm1198_vm8, %v2591_v38  ;;  %1914 = vmatprep.subr.mxu1 %v2229_v0  ;;  %v1492_v38 = vld [vmem:[%s2811_s17 + $0x50] sm:$0xff] }
 0x673   : > { %1946 = vmatprep.mubr.msk.f32.mxu1 %vm2230_vm0, %v2229_v0  ;;  %1915 = vmatpush3.msra.mxu1 %v1497_v32 }
 0x674   : > { %1916 = vmatprep.subr.mxu1 %v2229_v0 }
 0x675   : > { %1917 = vmatpush3.msra.mxu1 %v1496_v33 }
 0x676   : > { %1918 = vmatprep.subr.mxu1 %v2229_v0 }
 0x677   : > { %1919 = vmatpush3.msra.mxu1 %v1495_v35 }
 0x678   : > { %1920 = vmatprep.subr.mxu1 %v2229_v0 }
 0x679   : > { %1921 = vmatpush3.msra.mxu1 %v1494_v36 }
 0x67a   : > { %1922 = vmatprep.subr.mxu1 %v2229_v0 }
 0x67b   : > { %1923 = vmatpush3.msra.mxu1 %v1493_v37 }
 0x67c   : > { %1924 = vmatprep.subr.mxu1 %v2229_v0 }
 0x67d   : > { %1925 = vmatpush3.msra.mxu1 %v1492_v38 }
 0x67e   : > { %1926 = vmatprep.subr.mxu1 %v2229_v0 }
 0x67f   : > { %1927 = vmatpush3.msra.mxu1 %v1491_v39 }
 0x680   : > { %1928 = vmatprep.subr.mxu1 %v2229_v0 }
 0x681   : > { %1929 = vmatpush3.msra.mxu1 %v1490_v40 }
 0x682   : > { %1930 = vmatprep.subr.mxu1 %v2229_v0 }
 0x683   : > { %1931 = vmatpush3.msra.mxu1 %v1489_v41 }
 0x684   : > { %1932 = vmatprep.subr.mxu1 %v2229_v0 }
 0x685   : > { %1933 = vmatpush3.msra.mxu1 %v1488_v42 }
 0x686   : > { %1934 = vmatprep.subr.mxu1 %v2229_v0 }
 0x687   : > { %1935 = vmatpush3.msra.mxu1 %v1487_v43 }
 0x688   : > { %1936 = vmatprep.subr.mxu1 %v2229_v0 }
 0x689   : > { %1937 = vmatpush3.msra.mxu1 %v1486_v44 }
 0x68a   : > { %1938 = vmatprep.subr.mxu1 %v2229_v0 }
 0x68b   : > { %1939 = vmatpush3.msra.mxu1 %v1485_v45 }
 0x68c   : > { %1940 = vmatprep.subr.mxu1 %v2229_v0 }
 0x68d   : > { %1941 = vmatpush3.msra.mxu1 %v1484_v46 }
 0x68e   : > { %1942 = vmatprep.subr.mxu1 %v2229_v0 }
 0x68f   : > { %1943 = vmatpush3.msra.mxu1 %v1483_v47 }
 0x690   : > { %1944 = vmatprep.subr.mxu1 %v2229_v0 }
 0x691   : > { %1945 = vmatpush3.msra.mxu1 %v1482_v48 }
 0x732   : > { %v1473_v49 = vpop.f32.mrf.mxu1 }
 0x733   : > { %1478 = vrot.lane.b32.xlu0 %v1473_v49, %s2231_s24  ;;  %s2149_s24 = scalar_lea.vmem %s1626_s25, 128 }
 0x734   : > { %v1913_v50 = vpop.f32.mrf.mxu1  ;;  %p2150_p6 = scmp.ne.s32.totalorder %s1626_s25, %s2149_s24  ;;  %p2157_p7 = scmp.lt.s32.totalorder %s2155_s0, %s2149_s24 }
 0x736   : > { %p2151_p0 = pnand %p2150_p6, %p2866_p12  ;;  %p2158_p9 = por %p2157_p7, %p2156_p3 }
 0x738   : > { %p2152_p5 = pneg %p2151_p0 }
 0x73a   : > { %p2159_p13 = pnand %p2158_p9, %p2152_p5 }
 0x7a5   : > { %v1479_v51 = vpop.permute.xlu0 %1478 }
 0x7a6   : > { %v1481_v52 = vsel %vm1030_vm5, %v1406_v31, %v1479_v51 }
 0x7a7   : > { %1947 = vmatmul.mubr.f32.vlgmr.msra.gmra.mxu1 %v1481_v52 }
 0x867   : > { %v1564_v53 = vpop.f32.mrf.mxu1 }
 0x868   : > { %v1570_v54 = vrot.slane %v1564_v53, 4  ;;  %v1577_v55 = vmul.f32 %v1564_v53, %v1564_v53 }
 0x869   : > { %v1948_v56 = vpop.f32.mrf.mxu1 }
 0x86a   : > { %v1571_v57 = vadd.f32 %v1570_v54, %v1564_v53  ;;  %v1578_v58 = vrot.slane %v1577_v55, 4 }
 0x86c   : > { %v1572_v0 = vrot.slane %v1571_v57, 2  ;;  %v1579_v59 = vadd.f32 %v1578_v58, %v1577_v55 }
 0x86e   : > { %v1573_v60 = vadd.f32 %v1572_v0, %v1571_v57  ;;  %v1580_v61 = vrot.slane %v1579_v59, 2 }
 0x870   : > { %v1574_v62 = vrot.slane %v1573_v60, 1  ;;  %v1581_v63 = vadd.f32 %v1580_v61, %v1579_v59 }
 0x872   : > { %v1575_v1 = vadd.f32 %v1574_v62, %v1573_v60  ;;  %v1582_v2 = vrot.slane %v1581_v63, 1 }
 0x874   : > { %v1576_v3 = vmul.f32 0.125, %v1575_v1  ;;  %v1583_v4 = vadd.f32 %v1582_v2, %v1581_v63 }
 0x876   : > { %v1584_v5 = vmul.f32 0.125, %v1583_v4  ;;  %v1585_v6 = vmul.f32 %v1576_v3, %v1576_v3 }
 0x878   : > { %v1586_v7 = vsub.f32 %v1584_v5, %v1585_v6 }
 0x87a   : > { %v1587_v8 = vmax.f32 %v1586_v7, 0.0 }
 0x87c   : > { %v1588_v9 = vadd.f32 1e-05, %v1587_v8 }
 0x87e   : > { %2041 = vrsqrt.f32 %v1588_v9 }
 0x88b   : > { %v2042_v11 = vpop.eup %2041 }
 0x88c   : > { %v1590_v12 = vmul.f32 %v2042_v11, %v1568_v10 }
 0x88e   : > { %v1591_v14 = vmul.f32 %v1590_v12, %v1576_v3  ;;  %v1597_v15 = vrot.slane %v1590_v12, %v2508_v34 }
 0x890   : > { %v1592_v16 = vsub.f32 %v1569_v13, %v1591_v14  ;;  %v1599_v17 = vmul.f32 %v1597_v15, %v1564_v53 }
 0x892   : > { %v1604_v18 = vrot.slane %v1592_v16, %v2508_v34 }
 0x894   : > { %v1606_v19 = vadd.f32 %v1604_v18, %v1599_v17 }
 0x896   : > { %v1608_v20 = vmul.f32 0.01, %v1606_v19  ;;  %vm1607_vm10 = vcmp.gt.f32.partialorder %v1606_v19, 0.0 }
 0x898   : > { %v1609_v21 = vsel %vm1607_vm10, %v1606_v19, %v1608_v20 }
 0x899   : > { %1610 = vst [vmem:[%s701_s30] sm:$0xff] %v1609_v21 }
 0x89a   : > { %2162 = shalt.err (!%p2159_p13)
}
 0x89b   : > { %s2163_s27 = scalar_lea.hbm %s2757_s5, 128  ;;  %s2167_s29 = scalar_lea.hbm %s2865_s18, 256 }
 0x89c   : > { %p2164_p8 = scmp.ne.s32.totalorder %s2757_s5, %s2163_s27  ;;  %p2168_p1 = scmp.lt.s32.totalorder %s2757_s5, %s2865_s18 }
 0x89d   : > { %p2169_p2 = scmp.lt.s32.totalorder %s2167_s29, %s2163_s27 }
 0x89e   : > { %p2165_p10 = pnand %p2164_p8, %p2866_p12 }
 0x89f   : > { %p2170_p4 = por %p2169_p2, %p2168_p1 }
 0x8a0   : > { %p2166_p11 = pneg %p2165_p10 }
 0x8a2   : > { %p2171_p6 = pnand %p2170_p4, %p2166_p11 }
 0x8a4   : > { %2174 = shalt.err (!%p2171_p6)
}
 0x8a5   : > { %1963 = dma.vmem_to_hbm [thread:$0]  (%p2866_p12), %s1626_s25, 128, %s2757_s5, %s1612_s8  }
 0x8a6 PF: > { %s2867_s30 = sld [smem:[#allocation15_spill]] }
 0x8a7   : > { %s2868_s4 = sld [smem:[#allocation18_spill]] }
 0x8a8   : > { %s2869_s26 = sld [smem:[#allocation17_spill]] }
 0x8ac   : > { %s1637_s24 = sand.u32 1, %s2867_s30  }
 0x8ad   : > { %p2870_p0 = scmp.ne.s32.totalorder %s2868_s4, 0  ;;  %s1638_s2 = scalar_lea.sflag [#allocation4], %s1637_s24 }
 0x8ae   : > { %p2871_p5 = scmp.ge.s32.totalorder %s2869_s26, 2 }
 0x8b0   : > { %p1980_p3 = pnand %p2871_p5, %p2870_p0 }
 0x8b2   : > { %p1981_p7 = pneg %p1980_p3 }
 0x8b4   : > { %2204 = dma.done.wait (%p1981_p7), %s1638_s2, 128  }
 0x8b5   : > { %2206 = vsyncadd (%p1981_p7), %s1638_s2, 4294967168  ;;  %s2872_s24 = sld [smem:[#allocation19_spill]]  ;;  %s2875_s1 = smov %s2213_s22 }
 0x8b6   : > { %s2873_s3 = sld [smem:[#allocation16_spill]] }
 0x8b7   : > { %s2874_s23 = sld [smem:[#allocation20_spill]] }
 0x8bb   : > { %p35_p9 = scmp.ge.s32.totalorder %s2872_s24, 4  }
 0x8bc   : > { %s2876_s22 = smov %s2873_s3 }
 0x8bd   :  { %37 = sbr.rel (!%p35_p9) target bundleno = 18 (0x12), region = 160 }
 0x8c2   :  { %1643 = vsyncpa [#allocation3], 1 }
 0x8c3   :  { %1645 = vsyncpa [#allocation3 + $0x1], 1 }
 0x8c4   :  { %1646 = vsyncpa [#allocation6], 1 }
 0x8c5   :  { %1647 = vsyncpa [#allocation9], 1 }
 0x8c6   :  { %1648 = vsyncpa [#allocation4], 1 }
 0x8c7   :  { %1650 = vsyncpa [#allocation4 + $0x1], 1 }

</bundles_post_ra>
